<compile_context>
chip_gen: v7x
topology: tpu7x:2x2x1
jax: 0.10.0
libtpu: 0.0.40
codegen_flags: <defaults>
</compile_context>

<pallas_src>
import jax
import jax.numpy as jnp
from jax import lax
from jax.experimental import pallas as pl
from jax.experimental.pallas import tpu as pltpu


def style_encoder_kernel(x_ref, w1_ref, b1_ref, w2_ref, b2_ref, o_ref,
                         xstk_ref, hpad_ref):
    """Fused Conv1d+ReLU -> Conv1d+ReLU for one block of batch elements.

    x_ref   : (b_blk, C_in, T)       NCT input block (compute dtype)
    w1_ref  : (H, K1*C_in)           conv1 weights, taps folded into contraction
                                     (column order: k major, c minor)
    b1_ref  : (H, 1)    float32
    w2_ref  : (K2, H, H)             conv2 per-tap (H_out, H_in) matrices
    b2_ref  : (H, 1)    float32
    o_ref   : (b_blk, H, T)          NCT output block (T lane-dense)
    xstk_ref: (K1*C_in, b_blk*seg)   stacked/shifted conv1 input (compute dtype)
    hpad_ref: (H,      b_blk*seg)    zero-haloed conv1 output  (compute dtype)

    Geometry: each batch element owns one segment of width seg = T + 2*pm
    (pm = max(pad1, pad2)) in the concatenated lane dimension; its data sits at
    columns [b*seg + pm, b*seg + pm + T) and everything else is zero, so the
    zero gaps double as per-element conv padding and batch elements never bleed
    into each other.
    """
    b_blk, c_in, t_len = x_ref.shape
    h_dim = o_ref.shape[1]
    k1 = w1_ref.shape[1] // c_in
    k2 = w2_ref.shape[0]
    p1 = (k1 - 1) // 2
    p2 = (k2 - 1) // 2
    pm = max(p1, p2)
    seg = t_len + 2 * pm
    w_total = b_blk * seg
    cdt = xstk_ref.dtype            # MXU operand dtype (f32 or bf16)

    # ---- Stage the stacked (im2col-over-taps) conv1 input for the whole block.
    # Memset every grid step (scratch is per-core; with the parallel axis split
    # across v7x's two TCs, step 0 may never run on a given core).  The buffer
    # is tiny ((K1*C_in) x w_total) so the full memset is cheaper than many
    # 1-lane-wide masked halo stores.
    xstk_ref[...] = jnp.zeros(xstk_ref.shape, cdt)
    for b in range(b_blk):                       # static, small
        xb = x_ref[b, :, :]                      # (C_in, T), compute dtype
        base = b * seg + pm + p1
        for k in range(k1):
            # Row block k holds the input shifted so that one matmul with the
            # tap-folded weight performs the whole conv1 contraction.
            xstk_ref[k * c_in:(k + 1) * c_in, base - k:base - k + t_len] = xb

    # ---- Conv1d(C_in -> H, k1): ONE matmul for all taps and all batch
    # elements (contraction = K1*C_in, N = b_blk*seg).  f32 accumulation.
    acc1 = jnp.dot(w1_ref[...], xstk_ref[...],
                   preferred_element_type=jnp.float32)        # (H, w_total)

    # Valid-data column mask: columns [b*seg + pm, b*seg + pm + T).  Columns in
    # the inter-element gaps hold garbage conv outputs and must be zeroed so
    # they act as conv2's zero padding.
    col = lax.broadcasted_iota(jnp.int32, (1, w_total), 1)
    valid = (col >= pm) & (col < pm + t_len)
    for b in range(1, b_blk):                    # static unroll, b_blk <= 8
        lo = b * seg + pm
        valid = valid | ((col >= lo) & (col < lo + t_len))

    # Bias + ReLU + zero halos, stored once in the compute dtype.
    h1 = jnp.maximum(acc1 + b1_ref[...], 0.0)
    hpad_ref[...] = jnp.where(valid, h1, 0.0).astype(cdt)

    # ---- Conv1d(H -> H, k2): per-tap shifted matmuls over the whole block.
    # No interleaved VPU work inside the chain (bias/ReLU only afterwards) so
    # the accumulation can stay in the MXU result buffer on v7x.
    n2 = w_total - (k2 - 1)
    acc2 = jnp.zeros((h_dim, n2), jnp.float32)
    for k in range(k2):
        acc2 = acc2 + jnp.dot(w2_ref[k], hpad_ref[:, k:k + n2],
                              preferred_element_type=jnp.float32)

    # ---- Bias + ReLU, lane-dense (H, T) stores straight into the NCT output.
    for b in range(b_blk):
        off = b * seg + pm - p2
        o_ref[b, :, :] = jnp.maximum(
            acc2[:, off:off + t_len] + b2_ref[...], 0.0).astype(o_ref.dtype)


def _num_tensorcores():
    """Best-effort detection of TensorCores per chip (v7x has 2, v5e/v6e 1)."""
    try:
        kind = jax.devices()[0].device_kind.lower()
    except Exception:
        return 1
    return 2 if "v7" in kind else 1


def _pick_batch_block(batch, num_tensorcores=1, max_block=8):
    """Largest divisor of `batch` (capped at max_block).  On single-TC chips
    (v5e/v6e) use one grid step; keep >= num_tensorcores grid steps only when
    there are multiple TensorCores (v7x), so the parallel axis feeds every core."""
    best = 1
    for cand in range(1, min(batch, max_block) + 1):
        if batch % cand != 0:
            continue
        if num_tensorcores > 1 and batch // cand < num_tensorcores:
            continue
        best = cand
    return best


def style_encoder(style_input, style_length, params, *, compute_dtype=None,
                  batch_block=None):
    """JAX/Pallas equivalent of StyleEncoder.forward.

    style_input : (B, C_in, T) NCT float array (PyTorch Conv1d layout)
    style_length: (B,)         accepted but unused (matches reference forward)
    params      : (w1, b1, w2, b2) in PyTorch layout: w (O, I, K), b (O,)
    compute_dtype: optional MXU operand dtype (e.g. jnp.bfloat16) — halves
                   input/weight DMA bytes and scratch VMEM; accumulation is f32.
    returns (encoded NCT (B, H, T), {})
    """
    del style_length  # unused in the reference forward as well
    w1, b1, w2, b2 = params
    B, C_in, T = style_input.shape
    H, _, K1 = w1.shape
    K2 = w2.shape[2]
    # PyTorch Conv1d(padding=K//2) only preserves length for odd K; this kernel
    # assumes symmetric (K-1)//2 padding, so require odd kernels.
    assert K1 % 2 == 1 and K2 % 2 == 1, "odd kernel sizes required (padding=(K-1)//2)"
    p1, p2 = (K1 - 1) // 2, (K2 - 1) // 2
    pm = max(p1, p2)

    cdt = style_input.dtype if compute_dtype is None else compute_dtype
    b_blk = (_pick_batch_block(B, _num_tensorcores())
             if batch_block is None else batch_block)
    assert B % b_blk == 0, (B, b_blk)

    seg = T + 2 * pm
    w_total = b_blk * seg

    # Wrapper glue is dtype casts and tiny weight reshapes only: no input
    # transpose (channels-first kept end-to-end) and no output transpose.
    x = style_input.astype(cdt)                                        # (B, C_in, T)
    # Conv1 weight with taps folded into the contraction: column k*C_in + c.
    w1_mat = jnp.transpose(w1, (0, 2, 1)).reshape(H, K1 * C_in).astype(cdt)
    w2_k = jnp.transpose(w2, (2, 0, 1)).astype(cdt)                    # (K2, H_out, H_in)
    b1_2d = b1.reshape(H, 1).astype(jnp.float32)
    b2_2d = b2.reshape(H, 1).astype(jnp.float32)

    out_nct = pl.pallas_call(
        style_encoder_kernel,
        out_shape=jax.ShapeDtypeStruct((B, H, T), style_input.dtype),
        grid_spec=pltpu.PrefetchScalarGridSpec(
            num_scalar_prefetch=0,
            grid=(B // b_blk,),
            in_specs=[
                pl.BlockSpec((b_blk, C_in, T), lambda i: (i, 0, 0)),
                pl.BlockSpec((H, K1 * C_in), lambda i: (0, 0)),
                pl.BlockSpec((H, 1), lambda i: (0, 0)),
                pl.BlockSpec((K2, H, H), lambda i: (0, 0, 0)),
                pl.BlockSpec((H, 1), lambda i: (0, 0)),
            ],
            out_specs=pl.BlockSpec((b_blk, H, T), lambda i: (i, 0, 0)),
            scratch_shapes=[
                pltpu.VMEM((K1 * C_in, w_total), cdt),   # stacked conv1 input
                pltpu.VMEM((H, w_total), cdt),           # zero-haloed conv1 out
            ],
        ),
        compiler_params=pltpu.CompilerParams(
            dimension_semantics=("parallel",),
            vmem_limit_bytes=32 * 1024 * 1024,
        ),
    )(x, w1_mat, b1_2d, w2_k, b2_2d)

    return out_nct, {}


if __name__ == "__main__":
    # T = 128 keeps the output lane dim at the full 128-lane width (un-masked,
    # lane-dense stores).
    B, C_in, T, H, K = 4, 4, 128, 32, 3

    key = jax.random.PRNGKey(0)
    kx, kw1, kb1, kw2, kb2 = jax.random.split(key, 5)

    style_input = jax.random.normal(kx, (B, C_in, T), jnp.float32)
    style_length = jnp.full((B,), T, dtype=jnp.int32)   # unused by forward

    # Deterministic synthetic parameters (PyTorch Conv1d weight layout (O, I, K)).
    w1 = 0.1 * jax.random.normal(kw1, (H, C_in, K), jnp.float32)
    b1 = 0.1 * jax.random.normal(kb1, (H,), jnp.float32)
    w2 = 0.1 * jax.random.normal(kw2, (H, H, K), jnp.float32)
    b2 = 0.1 * jax.random.normal(kb2, (H,), jnp.float32)

    # Pure-JAX reference (lax conv, highest precision) to validate semantics.
    def conv1d_nct(x, w, b, p):
        y = lax.conv_general_dilated(
            x, w, window_strides=(1,), padding=[(p, p)],
            dimension_numbers=("NCH", "OIH", "NCH"),
            precision=lax.Precision.HIGHEST)
        return y + b[None, :, None]

    ref = jnp.maximum(conv1d_nct(style_input, w1, b1, (K - 1) // 2), 0.0)
    ref = jnp.maximum(conv1d_nct(ref, w2, b2, (K - 1) // 2), 0.0)

    # float32 path: exact module semantics, tight tolerance.
    out, extras = style_encoder(style_input, style_length, (w1, b1, w2, b2))
    out = jax.block_until_ready(out)
    assert isinstance(extras, dict) and not extras
    assert out.shape == ref.shape == (B, H, T)
    assert float(jnp.max(jnp.abs(out - ref))) < 2e-4

    # bf16 operand path (halves input/weight DMA bytes & scratch); f32 accumulation.
    out_bf16, _ = style_encoder(style_input, style_length, (w1, b1, w2, b2),
                                compute_dtype=jnp.bfloat16)
    out_bf16 = jax.block_until_ready(out_bf16)
    assert float(jnp.max(jnp.abs(out_bf16 - ref))) < 5e-2

    print("KERNEL_OK")
</pallas_src>

<mosaic_0001>
module attributes {stable_mosaic.version = 11 : i64} {
  func.func @style_encoder_kernel(%arg0: i32, %arg1: memref<4x4x128xf32, #tpu.memory_space<vmem>>, %arg2: memref<32x12xf32, #tpu.memory_space<vmem>>, %arg3: memref<32x1xf32, #tpu.memory_space<vmem>>, %arg4: memref<3x32x32xf32, #tpu.memory_space<vmem>>, %arg5: memref<32x1xf32, #tpu.memory_space<vmem>>, %arg6: memref<4x32x128xf32, #tpu.memory_space<vmem>>, %arg7: memref<12x520xf32, #tpu.memory_space<vmem>>, %arg8: memref<32x520xf32, #tpu.memory_space<vmem>>) attributes {dimension_semantics = [#tpu.dimension_semantics<parallel>], iteration_bounds = array<i64: 1>, scalar_prefetch = 0 : i64, scratch_operands = 2 : i64, tpu.core_type = #tpu.core_type<tc>, window_params = [{transform_indices = @transform_0, window_bounds = array<i64: 4, 4, 128>}, {pipeline_mode = #tpu.pipeline_mode<synchronous>, transform_indices = @transform_1, window_bounds = array<i64: 32, 12>}, {pipeline_mode = #tpu.pipeline_mode<synchronous>, transform_indices = @transform_2, window_bounds = array<i64: 32, 1>}, {pipeline_mode = #tpu.pipeline_mode<synchronous>, transform_indices = @transform_3, window_bounds = array<i64: 3, 32, 32>}, {pipeline_mode = #tpu.pipeline_mode<synchronous>, transform_indices = @transform_4, window_bounds = array<i64: 32, 1>}, {transform_indices = @transform_5, window_bounds = array<i64: 4, 32, 128>}]} {
    %cst = arith.constant 0.000000e+00 : f32
    %0 = vector.broadcast %cst : f32 to vector<12x520xf32>
    %c0 = arith.constant 0 : index
    %c0_0 = arith.constant 0 : index
    %1 = vector.load %arg7[%c0, %c0_0] : memref<12x520xf32, #tpu.memory_space<vmem>>, vector<12x520xf32>
    tpu.vector_store %arg7[%c0, %c0_0], %0 {strides = array<i32>} : memref<12x520xf32, #tpu.memory_space<vmem>>, vector<12x520xf32>,
    %c0_1 = arith.constant 0 : index
    %c0_2 = arith.constant 0 : index
    %c0_3 = arith.constant 0 : index
    %2 = vector.load %arg1[%c0_1, %c0_2, %c0_3] : memref<4x4x128xf32, #tpu.memory_space<vmem>>, vector<1x4x128xf32>
    %3 = vector.shape_cast %2 : vector<1x4x128xf32> to vector<4x128xf32>
    %c0_4 = arith.constant 0 : index
    %c2 = arith.constant 2 : index
    %4 = vector.load %arg7[%c0_4, %c2] : memref<12x520xf32, #tpu.memory_space<vmem>>, vector<4x128xf32>
    tpu.vector_store %arg7[%c0_4, %c2], %3 {strides = array<i32>} : memref<12x520xf32, #tpu.memory_space<vmem>>, vector<4x128xf32>,
    %c4 = arith.constant 4 : index
    %c1 = arith.constant 1 : index
    %5 = vector.load %arg7[%c4, %c1] : memref<12x520xf32, #tpu.memory_space<vmem>>, vector<4x128xf32>
    tpu.vector_store %arg7[%c4, %c1], %3 {strides = array<i32>} : memref<12x520xf32, #tpu.memory_space<vmem>>, vector<4x128xf32>,
    %c8 = arith.constant 8 : index
    %c0_5 = arith.constant 0 : index
    %6 = vector.load %arg7[%c8, %c0_5] : memref<12x520xf32, #tpu.memory_space<vmem>>, vector<4x128xf32>
    tpu.vector_store %arg7[%c8, %c0_5], %3 {strides = array<i32>} : memref<12x520xf32, #tpu.memory_space<vmem>>, vector<4x128xf32>,
    %c1_6 = arith.constant 1 : index
    %c0_7 = arith.constant 0 : index
    %c0_8 = arith.constant 0 : index
    %7 = vector.load %arg1[%c1_6, %c0_7, %c0_8] : memref<4x4x128xf32, #tpu.memory_space<vmem>>, vector<1x4x128xf32>
    %8 = vector.shape_cast %7 : vector<1x4x128xf32> to vector<4x128xf32>
    %c0_9 = arith.constant 0 : index
    %c132 = arith.constant 132 : index
    %9 = vector.load %arg7[%c0_9, %c132] : memref<12x520xf32, #tpu.memory_space<vmem>>, vector<4x128xf32>
    tpu.vector_store %arg7[%c0_9, %c132], %8 {strides = array<i32>} : memref<12x520xf32, #tpu.memory_space<vmem>>, vector<4x128xf32>,
    %c4_10 = arith.constant 4 : index
    %c131 = arith.constant 131 : index
    %10 = vector.load %arg7[%c4_10, %c131] : memref<12x520xf32, #tpu.memory_space<vmem>>, vector<4x128xf32>
    tpu.vector_store %arg7[%c4_10, %c131], %8 {strides = array<i32>} : memref<12x520xf32, #tpu.memory_space<vmem>>, vector<4x128xf32>,
    %c8_11 = arith.constant 8 : index
    %c130 = arith.constant 130 : index
    %11 = vector.load %arg7[%c8_11, %c130] : memref<12x520xf32, #tpu.memory_space<vmem>>, vector<4x128xf32>
    tpu.vector_store %arg7[%c8_11, %c130], %8 {strides = array<i32>} : memref<12x520xf32, #tpu.memory_space<vmem>>, vector<4x128xf32>,
    %c2_12 = arith.constant 2 : index
    %c0_13 = arith.constant 0 : index
    %c0_14 = arith.constant 0 : index
    %12 = vector.load %arg1[%c2_12, %c0_13, %c0_14] : memref<4x4x128xf32, #tpu.memory_space<vmem>>, vector<1x4x128xf32>
    %13 = vector.shape_cast %12 : vector<1x4x128xf32> to vector<4x128xf32>
    %c0_15 = arith.constant 0 : index
    %c262 = arith.constant 262 : index
    %14 = vector.load %arg7[%c0_15, %c262] : memref<12x520xf32, #tpu.memory_space<vmem>>, vector<4x128xf32>
    tpu.vector_store %arg7[%c0_15, %c262], %13 {strides = array<i32>} : memref<12x520xf32, #tpu.memory_space<vmem>>, vector<4x128xf32>,
    %c4_16 = arith.constant 4 : index
    %c261 = arith.constant 261 : index
    %15 = vector.load %arg7[%c4_16, %c261] : memref<12x520xf32, #tpu.memory_space<vmem>>, vector<4x128xf32>
    tpu.vector_store %arg7[%c4_16, %c261], %13 {strides = array<i32>} : memref<12x520xf32, #tpu.memory_space<vmem>>, vector<4x128xf32>,
    %c8_17 = arith.constant 8 : index
    %c260 = arith.constant 260 : index
    %16 = vector.load %arg7[%c8_17, %c260] : memref<12x520xf32, #tpu.memory_space<vmem>>, vector<4x128xf32>
    tpu.vector_store %arg7[%c8_17, %c260], %13 {strides = array<i32>} : memref<12x520xf32, #tpu.memory_space<vmem>>, vector<4x128xf32>,
    %c3 = arith.constant 3 : index
    %c0_18 = arith.constant 0 : index
    %c0_19 = arith.constant 0 : index
    %17 = vector.load %arg1[%c3, %c0_18, %c0_19] : memref<4x4x128xf32, #tpu.memory_space<vmem>>, vector<1x4x128xf32>
    %18 = vector.shape_cast %17 : vector<1x4x128xf32> to vector<4x128xf32>
    %c0_20 = arith.constant 0 : index
    %c392 = arith.constant 392 : index
    %19 = vector.load %arg7[%c0_20, %c392] : memref<12x520xf32, #tpu.memory_space<vmem>>, vector<4x128xf32>
    tpu.vector_store %arg7[%c0_20, %c392], %18 {strides = array<i32>} : memref<12x520xf32, #tpu.memory_space<vmem>>, vector<4x128xf32>,
    %c4_21 = arith.constant 4 : index
    %c391 = arith.constant 391 : index
    %20 = vector.load %arg7[%c4_21, %c391] : memref<12x520xf32, #tpu.memory_space<vmem>>, vector<4x128xf32>
    tpu.vector_store %arg7[%c4_21, %c391], %18 {strides = array<i32>} : memref<12x520xf32, #tpu.memory_space<vmem>>, vector<4x128xf32>,
    %c8_22 = arith.constant 8 : index
    %c390 = arith.constant 390 : index
    %21 = vector.load %arg7[%c8_22, %c390] : memref<12x520xf32, #tpu.memory_space<vmem>>, vector<4x128xf32>
    tpu.vector_store %arg7[%c8_22, %c390], %18 {strides = array<i32>} : memref<12x520xf32, #tpu.memory_space<vmem>>, vector<4x128xf32>,
    %c0_23 = arith.constant 0 : index
    %c0_24 = arith.constant 0 : index
    %22 = vector.load %arg2[%c0_23, %c0_24] : memref<32x12xf32, #tpu.memory_space<vmem>>, vector<32x12xf32>
    %c0_25 = arith.constant 0 : index
    %c0_26 = arith.constant 0 : index
    %23 = vector.load %arg7[%c0_25, %c0_26] : memref<12x520xf32, #tpu.memory_space<vmem>>, vector<12x520xf32>
    %cst_27 = arith.constant dense<0.000000e+00> : vector<32x520xf32>
    %24 = tpu.matmul %22, %23, %cst_27 {dimension_numbers = #tpu.dot_dimension_numbers<[1], [0], [0], [1], [0, 0, 1, 1], [], []>} : vector<32x12xf32>, vector<12x520xf32>, vector<32x520xf32> -> vector<32x520xf32>
    %25 = tpu.iota {dimensions = array<i32: 1>} : vector<1x520xi32>
    %c1_i32 = arith.constant 1 : i32
    %26 = vector.broadcast %c1_i32 : i32 to vector<1x520xi32>
    %27 = arith.cmpi sge, %25, %26 : vector<1x520xi32>
    %c129_i32 = arith.constant 129 : i32
    %28 = vector.broadcast %c129_i32 : i32 to vector<1x520xi32>
    %29 = arith.cmpi slt, %25, %28 : vector<1x520xi32>
    %30 = arith.andi %27, %29 : vector<1x520xi1>
    %c131_i32 = arith.constant 131 : i32
    %31 = vector.broadcast %c131_i32 : i32 to vector<1x520xi32>
    %32 = arith.cmpi sge, %25, %31 : vector<1x520xi32>
    %c259_i32 = arith.constant 259 : i32
    %33 = vector.broadcast %c259_i32 : i32 to vector<1x520xi32>
    %34 = arith.cmpi slt, %25, %33 : vector<1x520xi32>
    %35 = arith.andi %32, %34 : vector<1x520xi1>
    %36 = arith.ori %30, %35 : vector<1x520xi1>
    %c261_i32 = arith.constant 261 : i32
    %37 = vector.broadcast %c261_i32 : i32 to vector<1x520xi32>
    %38 = arith.cmpi sge, %25, %37 : vector<1x520xi32>
    %c389_i32 = arith.constant 389 : i32
    %39 = vector.broadcast %c389_i32 : i32 to vector<1x520xi32>
    %40 = arith.cmpi slt, %25, %39 : vector<1x520xi32>
    %41 = arith.andi %38, %40 : vector<1x520xi1>
    %42 = arith.ori %36, %41 : vector<1x520xi1>
    %c391_i32 = arith.constant 391 : i32
    %43 = vector.broadcast %c391_i32 : i32 to vector<1x520xi32>
    %44 = arith.cmpi sge, %25, %43 : vector<1x520xi32>
    %c519_i32 = arith.constant 519 : i32
    %45 = vector.broadcast %c519_i32 : i32 to vector<1x520xi32>
    %46 = arith.cmpi slt, %25, %45 : vector<1x520xi32>
    %47 = arith.andi %44, %46 : vector<1x520xi1>
    %48 = arith.ori %42, %47 : vector<1x520xi1>
    %c0_28 = arith.constant 0 : index
    %c0_29 = arith.constant 0 : index
    %49 = vector.load %arg3[%c0_28, %c0_29] : memref<32x1xf32, #tpu.memory_space<vmem>>, vector<32x1xf32>
    %50 = vector.broadcast %49 : vector<32x1xf32> to vector<32x520xf32>
    %51 = arith.addf %24, %50 : vector<32x520xf32>
    %cst_30 = arith.constant 0.000000e+00 : f32
    %52 = vector.broadcast %cst_30 : f32 to vector<32x520xf32>
    %53 = arith.maximumf %51, %52 : vector<32x520xf32>
    %cst_31 = arith.constant 0.000000e+00 : f32
    %54 = vector.shape_cast %48 : vector<1x520xi1> to vector<1x520xi1>
    %55 = vector.broadcast %54 : vector<1x520xi1> to vector<32x520xi1>
    %56 = vector.broadcast %cst_31 : f32 to vector<32x520xf32>
    %57 = arith.select %55, %53, %56 : vector<32x520xi1>, vector<32x520xf32>
    %c0_32 = arith.constant 0 : index
    %c0_33 = arith.constant 0 : index
    %58 = vector.load %arg8[%c0_32, %c0_33] : memref<32x520xf32, #tpu.memory_space<vmem>>, vector<32x520xf32>
    tpu.vector_store %arg8[%c0_32, %c0_33], %57 {strides = array<i32>} : memref<32x520xf32, #tpu.memory_space<vmem>>, vector<32x520xf32>,
    %cst_34 = arith.constant 0.000000e+00 : f32
    %59 = vector.broadcast %cst_34 : f32 to vector<32x518xf32>
    %c0_35 = arith.constant 0 : index
    %c0_36 = arith.constant 0 : index
    %c0_37 = arith.constant 0 : index
    %60 = vector.load %arg4[%c0_35, %c0_36, %c0_37] : memref<3x32x32xf32, #tpu.memory_space<vmem>>, vector<1x32x32xf32>
    %61 = vector.shape_cast %60 : vector<1x32x32xf32> to vector<32x32xf32>
    %c0_38 = arith.constant 0 : index
    %c0_39 = arith.constant 0 : index
    %62 = vector.load %arg8[%c0_38, %c0_39] : memref<32x520xf32, #tpu.memory_space<vmem>>, vector<32x518xf32>
    %cst_40 = arith.constant dense<0.000000e+00> : vector<32x518xf32>
    %63 = tpu.matmul %61, %62, %cst_40 {dimension_numbers = #tpu.dot_dimension_numbers<[1], [0], [0], [1], [0, 0, 1, 1], [], []>} : vector<32x32xf32>, vector<32x518xf32>, vector<32x518xf32> -> vector<32x518xf32>
    %64 = arith.addf %59, %63 : vector<32x518xf32>
    %c1_41 = arith.constant 1 : index
    %c0_42 = arith.constant 0 : index
    %c0_43 = arith.constant 0 : index
    %65 = vector.load %arg4[%c1_41, %c0_42, %c0_43] : memref<3x32x32xf32, #tpu.memory_space<vmem>>, vector<1x32x32xf32>
    %66 = vector.shape_cast %65 : vector<1x32x32xf32> to vector<32x32xf32>
    %c0_44 = arith.constant 0 : index
    %c1_45 = arith.constant 1 : index
    %67 = vector.load %arg8[%c0_44, %c1_45] : memref<32x520xf32, #tpu.memory_space<vmem>>, vector<32x518xf32>
    %cst_46 = arith.constant dense<0.000000e+00> : vector<32x518xf32>
    %68 = tpu.matmul %66, %67, %cst_46 {dimension_numbers = #tpu.dot_dimension_numbers<[1], [0], [0], [1], [0, 0, 1, 1], [], []>} : vector<32x32xf32>, vector<32x518xf32>, vector<32x518xf32> -> vector<32x518xf32>
    %69 = arith.addf %64, %68 : vector<32x518xf32>
    %c2_47 = arith.constant 2 : index
    %c0_48 = arith.constant 0 : index
    %c0_49 = arith.constant 0 : index
    %70 = vector.load %arg4[%c2_47, %c0_48, %c0_49] : memref<3x32x32xf32, #tpu.memory_space<vmem>>, vector<1x32x32xf32>
    %71 = vector.shape_cast %70 : vector<1x32x32xf32> to vector<32x32xf32>
    %c0_50 = arith.constant 0 : index
    %c2_51 = arith.constant 2 : index
    %72 = vector.load %arg8[%c0_50, %c2_51] : memref<32x520xf32, #tpu.memory_space<vmem>>, vector<32x518xf32>
    %cst_52 = arith.constant dense<0.000000e+00> : vector<32x518xf32>
    %73 = tpu.matmul %71, %72, %cst_52 {dimension_numbers = #tpu.dot_dimension_numbers<[1], [0], [0], [1], [0, 0, 1, 1], [], []>} : vector<32x32xf32>, vector<32x518xf32>, vector<32x518xf32> -> vector<32x518xf32>
    %74 = arith.addf %69, %73 : vector<32x518xf32>
    %75 = vector.extract_strided_slice %74 {offsets = [0, 0], sizes = [32, 128], strides = [1, 1]} : vector<32x518xf32> to vector<32x128xf32>
    %c0_53 = arith.constant 0 : index
    %c0_54 = arith.constant 0 : index
    %76 = vector.load %arg5[%c0_53, %c0_54] : memref<32x1xf32, #tpu.memory_space<vmem>>, vector<32x1xf32>
    %77 = vector.broadcast %76 : vector<32x1xf32> to vector<32x128xf32>
    %78 = arith.addf %75, %77 : vector<32x128xf32>
    %cst_55 = arith.constant 0.000000e+00 : f32
    %79 = vector.broadcast %cst_55 : f32 to vector<32x128xf32>
    %80 = arith.maximumf %78, %79 : vector<32x128xf32>
    %c0_56 = arith.constant 0 : index
    %c0_57 = arith.constant 0 : index
    %c0_58 = arith.constant 0 : index
    %81 = vector.load %arg6[%c0_56, %c0_57, %c0_58] : memref<4x32x128xf32, #tpu.memory_space<vmem>>, vector<1x32x128xf32>
    %82 = vector.shape_cast %81 : vector<1x32x128xf32> to vector<32x128xf32>
    %83 = vector.shape_cast %80 : vector<32x128xf32> to vector<1x32x128xf32>
    tpu.vector_store %arg6[%c0_56, %c0_57, %c0_58], %83 {strides = array<i32>} : memref<4x32x128xf32, #tpu.memory_space<vmem>>, vector<1x32x128xf32>,
    %84 = vector.extract_strided_slice %74 {offsets = [0, 130], sizes = [32, 128], strides = [1, 1]} : vector<32x518xf32> to vector<32x128xf32>
    %c0_59 = arith.constant 0 : index
    %c0_60 = arith.constant 0 : index
    %85 = vector.load %arg5[%c0_59, %c0_60] : memref<32x1xf32, #tpu.memory_space<vmem>>, vector<32x1xf32>
    %86 = vector.broadcast %85 : vector<32x1xf32> to vector<32x128xf32>
    %87 = arith.addf %84, %86 : vector<32x128xf32>
    %cst_61 = arith.constant 0.000000e+00 : f32
    %88 = vector.broadcast %cst_61 : f32 to vector<32x128xf32>
    %89 = arith.maximumf %87, %88 : vector<32x128xf32>
    %c1_62 = arith.constant 1 : index
    %c0_63 = arith.constant 0 : index
    %c0_64 = arith.constant 0 : index
    %90 = vector.load %arg6[%c1_62, %c0_63, %c0_64] : memref<4x32x128xf32, #tpu.memory_space<vmem>>, vector<1x32x128xf32>
    %91 = vector.shape_cast %90 : vector<1x32x128xf32> to vector<32x128xf32>
    %92 = vector.shape_cast %89 : vector<32x128xf32> to vector<1x32x128xf32>
    tpu.vector_store %arg6[%c1_62, %c0_63, %c0_64], %92 {strides = array<i32>} : memref<4x32x128xf32, #tpu.memory_space<vmem>>, vector<1x32x128xf32>,
    %93 = vector.extract_strided_slice %74 {offsets = [0, 260], sizes = [32, 128], strides = [1, 1]} : vector<32x518xf32> to vector<32x128xf32>
    %c0_65 = arith.constant 0 : index
    %c0_66 = arith.constant 0 : index
    %94 = vector.load %arg5[%c0_65, %c0_66] : memref<32x1xf32, #tpu.memory_space<vmem>>, vector<32x1xf32>
    %95 = vector.broadcast %94 : vector<32x1xf32> to vector<32x128xf32>
    %96 = arith.addf %93, %95 : vector<32x128xf32>
    %cst_67 = arith.constant 0.000000e+00 : f32
    %97 = vector.broadcast %cst_67 : f32 to vector<32x128xf32>
    %98 = arith.maximumf %96, %97 : vector<32x128xf32>
    %c2_68 = arith.constant 2 : index
    %c0_69 = arith.constant 0 : index
    %c0_70 = arith.constant 0 : index
    %99 = vector.load %arg6[%c2_68, %c0_69, %c0_70] : memref<4x32x128xf32, #tpu.memory_space<vmem>>, vector<1x32x128xf32>
    %100 = vector.shape_cast %99 : vector<1x32x128xf32> to vector<32x128xf32>
    %101 = vector.shape_cast %98 : vector<32x128xf32> to vector<1x32x128xf32>
    tpu.vector_store %arg6[%c2_68, %c0_69, %c0_70], %101 {strides = array<i32>} : memref<4x32x128xf32, #tpu.memory_space<vmem>>, vector<1x32x128xf32>,
    %102 = vector.extract_strided_slice %74 {offsets = [0, 390], sizes = [32, 128], strides = [1, 1]} : vector<32x518xf32> to vector<32x128xf32>
    %c0_71 = arith.constant 0 : index
    %c0_72 = arith.constant 0 : index
    %103 = vector.load %arg5[%c0_71, %c0_72] : memref<32x1xf32, #tpu.memory_space<vmem>>, vector<32x1xf32>
    %104 = vector.broadcast %103 : vector<32x1xf32> to vector<32x128xf32>
    %105 = arith.addf %102, %104 : vector<32x128xf32>
    %cst_73 = arith.constant 0.000000e+00 : f32
    %106 = vector.broadcast %cst_73 : f32 to vector<32x128xf32>
    %107 = arith.maximumf %105, %106 : vector<32x128xf32>
    %c3_74 = arith.constant 3 : index
    %c0_75 = arith.constant 0 : index
    %c0_76 = arith.constant 0 : index
    %108 = vector.load %arg6[%c3_74, %c0_75, %c0_76] : memref<4x32x128xf32, #tpu.memory_space<vmem>>, vector<1x32x128xf32>
    %109 = vector.shape_cast %108 : vector<1x32x128xf32> to vector<32x128xf32>
    %110 = vector.shape_cast %107 : vector<32x128xf32> to vector<1x32x128xf32>
    tpu.vector_store %arg6[%c3_74, %c0_75, %c0_76], %110 {strides = array<i32>} : memref<4x32x128xf32, #tpu.memory_space<vmem>>, vector<1x32x128xf32>,
    return
  }
  func.func @transform_0(%arg0: i32) -> (i32, i32, i32) {
    %c0_i32 = arith.constant 0 : i32
    %c0_i32_0 = arith.constant 0 : i32
    %c0_i32_1 = arith.constant 0 : i32
    return %arg0, %c0_i32, %c0_i32_0 : i32, i32, i32
  }
  func.func @transform_1(%arg0: i32) -> (i32, i32) {
    %c0_i32 = arith.constant 0 : i32
    %c0_i32_0 = arith.constant 0 : i32
    %c0_i32_1 = arith.constant 0 : i32
    return %c0_i32, %c0_i32_0 : i32, i32
  }
  func.func @transform_2(%arg0: i32) -> (i32, i32) {
    %c0_i32 = arith.constant 0 : i32
    %c0_i32_0 = arith.constant 0 : i32
    %c0_i32_1 = arith.constant 0 : i32
    return %c0_i32, %c0_i32_0 : i32, i32
  }
  func.func @transform_3(%arg0: i32) -> (i32, i32, i32) {
    %c0_i32 = arith.constant 0 : i32
    %c0_i32_0 = arith.constant 0 : i32
    %c0_i32_1 = arith.constant 0 : i32
    %c0_i32_2 = arith.constant 0 : i32
    return %c0_i32, %c0_i32_0, %c0_i32_1 : i32, i32, i32
  }
  func.func @transform_4(%arg0: i32) -> (i32, i32) {
    %c0_i32 = arith.constant 0 : i32
    %c0_i32_0 = arith.constant 0 : i32
    %c0_i32_1 = arith.constant 0 : i32
    return %c0_i32, %c0_i32_0 : i32, i32
  }
  func.func @transform_5(%arg0: i32) -> (i32, i32, i32) {
    %c0_i32 = arith.constant 0 : i32
    %c0_i32_0 = arith.constant 0 : i32
    %c0_i32_1 = arith.constant 0 : i32
    return %arg0, %c0_i32, %c0_i32_0 : i32, i32, i32
  }
}

</mosaic_0001>

<bundles_post_ra>
// kernel: tpu_custom_call.1
= control target key start
LH: loop header
LB: loop body
LE: loop exit
PB: predicated region body
PF: predicated region fallthrough
CT: control target
= control target key end

     0   :  { %s2384_s22 = smov 4   ;;  %s2385_s23 = smov 2   ;;  %v2386_v4 = vmov 0.0   ;;  %s3120_s0 = inlined_call_operand.vmem [shape: f32[4,4,128], index: 0, kind: input, shape index: {}]   ;;  %s3121_s1 = inlined_call_operand.vmem [shape: f32[32,12], index: 1, kind: input, shape index: {}]   ;;  %s3122_s2 = inlined_call_operand.vmem [shape: f32[32,1], index: 2, kind: input, shape index: {}]   ;;  %s3123_s3 = inlined_call_operand.vmem [shape: f32[3,32,32], index: 3, kind: input, shape index: {}]   ;;  %s3124_s4 = inlined_call_operand.vmem [shape: f32[32,1], index: 4, kind: input, shape index: {}]   ;;  %s3125_s5 = inlined_call_operand.hbm [shape: f32[4,32,128], index: 5, kind: output, shape index: {}]  }
   0x1   :  { %v1939_v0 = vld [vmem:[%s3120_s0 + $0x4] sm:$0xf]  ;;  %v33_v1 = vld [vmem:[%s3120_s0] sm:$0xf]  ;;  %27 = vst [vmem:[#allocation2 + $0x28] sm:$0xf] %v2386_v4  ;;  %331 = vmatprep.mubr.f32.mxu0 %v2386_v4  ;;  %432 = vmatprep.mubr.f32.mxu1 %v2386_v4 }
   0x2   :  { %54 = vrot.lane.b32.xlu1 %v1939_v0, %s2384_s22  ;;  %35 = vrot.lane.b32.xlu0 %v33_v1, %s2385_s23  ;;  %v61_v2 = vrot.slane %v1939_v0, 4  ;;  %v42_v3 = vrot.slane %v33_v1, 4  ;;  %21 = vst [vmem:[#allocation2] sm:$0xff] %v2386_v4  ;;  %22 = vst [vmem:[#allocation2 + $0x8] sm:$0xff] %v2386_v4 }
   0x3   :  { %23 = vst [vmem:[#allocation2 + $0x10] sm:$0xff] %v2386_v4  ;;  %24 = vst [vmem:[#allocation2 + $0x18] sm:$0xff] %v2386_v4 }
   0x4   :  { %28 = vst [vmem:[#allocation2 + $0x30] sm:$0xf] %v2386_v4  ;;  %29 = vst [vmem:[#allocation2 + $0x38] sm:$0xf] %v2386_v4 }
   0x5   :  { %30 = vst [vmem:[#allocation2 + $0x40] sm:$0xf] %v2386_v4  ;;  %50 = vst [vmem:[#allocation2 + $0x28] sm:$0xf] %v33_v1 }
   0x6   :  { %10 = vsyncpa [#allocation5], 0  ;;  %s2387_s24 = smov 3   ;;  %s2388_s25 = smov 1   ;;  %v1940_v5 = vld [vmem:[%s3120_s0 + $0x8] sm:$0xf]  ;;  %v133_v45 = vlaneseq }
   0x7   :  { %62 = vrot.lane.b32.xlu1 %v61_v2, %s2387_s24  ;;  %43 = vrot.lane.b32.xlu0 %v42_v3, %s2388_s25  ;;  %vm25_vm0 = vcmask 64512   ;;  %vm31_vm1 = vcmask 60416   ;;  %s2389_s28 = smov 6   ;;  %v84_v6 = vrot.slane %v1940_v5, 4  ;;  %v1941_v7 = vld [vmem:[%s3120_s0 + $0xc] sm:$0xf] }
   0x8   :  { %26 = vst.msk [vmem:[#allocation2 + $0x20] sm:$0xff] %vm25_vm0, %v2386_v4  ;;  %s2390_s6 = smov 5   ;;  %v106_v8 = vrot.slane %v1941_v7, 4  ;;  %s2391_s7 = smov 7   ;;  %v214_v9 = vld [vmem:[%s3122_s2] sm:$0xff]  ;;  %v215_v10 = vld [vmem:[%s3122_s2 + $0x8] sm:$0xff] }
   0x9   :  { %32 = vst.msk [vmem:[#allocation2 + $0x48] sm:$0xf] %vm31_vm1, %v2386_v4  ;;  %s2392_s8 = smov 8   ;;  %v2393_v11 = vmov 0   ;;  %v216_v12 = vld [vmem:[%s3122_s2 + $0x10] sm:$0xff]  ;;  %v217_v13 = vld [vmem:[%s3122_s2 + $0x18] sm:$0xff] }
   0xa   :  { %2235 = vset.pattern.permute.xlu0 %v2393_v11  ;;  %2234 = vset.pattern.permute.xlu1 %v2393_v11  ;;  %vm59_vm2 = vcmask 27648   ;;  %vm38_vm3 = vcmask 1043472   ;;  %vm40_vm4 = vcmask 11264   ;;  %vm57_vm5 = vcmask 1043488   ;;  %v119_v32 = vld [vmem:[%s3121_s1] sm:$0xff]  ;;  %v120_v33 = vld [vmem:[%s3121_s1 + $0x8] sm:$0xff] }
   0xb   :  { %77 = vrot.lane.b32.xlu1 %v1940_v5, %s2389_s28  ;;  %69 = vrot.lane.b32.xlu0 %v1939_v0, %s2385_s23  ;;  %vm67_vm6 = vcmask 23556   ;;  %vm46_vm7 = vcmask 1047564   ;;  %vm48_vm8 = vcmask 7172   ;;  %vm65_vm9 = vcmask 1047580   ;;  %v121_v35 = vld [vmem:[%s3121_s1 + $0x10] sm:$0xff]  ;;  %v122_v44 = vld [vmem:[%s3121_s1 + $0x18] sm:$0xff] }
   0xc   :  { %vm80_vm10 = vcmask 1043504   ;;  %vm82_vm11 = vcmask 44032   ;;  %vm88_vm12 = vcmask 1047596   ;;  %vm90_vm13 = vcmask 39940   ;;  %v128_v23 = vld [vmem:[#allocation2 + $0x28] sm:$0xf] }
   0xd   :  { %vm251_vm14 = vcmask 1043456   ;;  %vm110_vm15 = vcmask 1047612   ;;  %v2537_v46 = vand.u32 127, %v133_v45  ;;  %s2395_s1 = smov 127   ;;  %s2396_s23 = smov 126  }
   0xe   :  { %s2398_s29 = smov 122  }
   0xf   :  { %92 = vrot.lane.b32.xlu1 %v1940_v5, %s2384_s22  ;;  %85 = vrot.lane.b32.xlu0 %v84_v6, %s2390_s6  ;;  %v135_v47 = vadd.s32 128, %v2537_v46  ;;  %v136_v3 = vadd.s32 256, %v2537_v46 }
  0x13   :  { %107 = vrot.lane.b32.xlu1 %v106_v8, %s2391_s7  ;;  %100 = vrot.lane.b32.xlu0 %v1941_v7, %s2392_s8 }
  0x17   :  { %114 = vrot.lane.b32.xlu0 %v1941_v7, %s2389_s28  ;;  %220 = vperm.xlu1 %2234, %v214_v9  }
  0x1b   :  { %225 = vperm.xlu0 %2235, %v215_v10   ;;  %230 = vperm.xlu1 %2234, %v216_v12  }
  0x1f   :  { %235 = vperm.xlu1 %2234, %v217_v13   ;;  %v137_v13 = vadd.s32 384, %v2537_v46 }
  0x74   :  { %v55_v14 = vpop.permute.xlu1 %54  ;;  %v36_v15 = vpop.permute.xlu0 %35 }
  0x75   :  { %60 = vst.msk [vmem:[#allocation2 + $0x10] sm:$0xf] %vm59_vm2, %v55_v14 }
  0x76   :  { %39 = vst.msk [vmem:[#allocation2] sm:$0xf] %vm38_vm3, %v36_v15 }
  0x77   :  { %41 = vst.msk [vmem:[#allocation2 + $0x8] sm:$0xf] %vm40_vm4, %v36_v15 }
  0x78   :  { %58 = vst.msk [vmem:[#allocation2 + $0x8] sm:$0xf] %vm57_vm5, %v55_v14 }
  0x79   :  { %v63_v16 = vpop.permute.xlu1 %62  ;;  %v44_v17 = vpop.permute.xlu0 %43 }
  0x7a   :  { %68 = vst.msk [vmem:[#allocation2 + $0x10] sm:$0xf0] %vm67_vm6, %v63_v16  ;;  %vm112_vm6 = vcmask 56324  }
  0x7b   :  { %47 = vst.msk [vmem:[#allocation2] sm:$0xf0] %vm46_vm7, %v44_v17  ;;  %vm103_vm7 = vcmask 1043520  }
  0x7c   :  { %49 = vst.msk [vmem:[#allocation2 + $0x8] sm:$0xf0] %vm48_vm8, %v44_v17  ;;  %vm139_vm8 = vcmp.ge.s32.totalorder %v2537_v46, 1 }
  0x7d   :  { %66 = vst.msk [vmem:[#allocation2 + $0x8] sm:$0xf0] %vm65_vm9, %v63_v16  ;;  %v78_v18 = vpop.permute.xlu1 %77  ;;  %v70_v19 = vpop.permute.xlu0 %69 }
  0x7e   :  { %81 = vst.msk [vmem:[#allocation2 + $0x10] sm:$0xf] %vm80_vm10, %v78_v18 }
  0x7f   :  { %83 = vst.msk [vmem:[#allocation2 + $0x18] sm:$0xf] %vm82_vm11, %v78_v18 }
  0x80   :  { %72 = vst.msk [vmem:[#allocation2 + $0x30] sm:$0xf] %vm38_vm3, %v70_v19  ;;  %vm2394_vm3 = vmmov 1  }
  0x81   :  { %73 = vst.msk [vmem:[#allocation2 + $0x38] sm:$0xf] %vm40_vm4, %v70_v19  ;;  %v93_v20 = vpop.permute.xlu1 %92  ;;  %v86_v21 = vpop.permute.xlu0 %85  ;;  %vm2482_vm4 = vmpackc.low %vm251_vm14, %vm2394_vm3  ;;  %vm197_vm14 = vcmp.ge.s32.totalorder %v137_v13, 391 }
  0x82   :  { %95 = vst.msk [vmem:[#allocation2 + $0x38] sm:$0xf] %vm57_vm5, %v93_v20  ;;  %v123_v22 = vld [vmem:[#allocation2] sm:$0xff]  ;;  %vm155_vm5 = vcmp.ge.s32.totalorder %v135_v47, 131 }
  0x83   :  { %96 = vst.msk [vmem:[#allocation2 + $0x40] sm:$0xf] %vm59_vm2, %v93_v20  ;;  %v2088_v30 = vpack.c.bf16 %v128_v23, %v123_v22  ;;  %vm238_vm2 = vcmask 97280  }
  0x84   :  { %89 = vst.msk [vmem:[#allocation2 + $0x10] sm:$0xf0] %vm88_vm12, %v86_v21  ;;  %v124_v26 = vld [vmem:[#allocation2 + $0x8] sm:$0xff] }
  0x85   :  { %91 = vst.msk [vmem:[#allocation2 + $0x18] sm:$0xf0] %vm90_vm13, %v86_v21  ;;  %v108_v24 = vpop.permute.xlu1 %107  ;;  %v101_v25 = vpop.permute.xlu0 %100  ;;  %vm182_vm13 = vcmp.lt.s32.totalorder %v137_v13, 389 }
  0x86   :  { %111 = vst.msk [vmem:[#allocation2 + $0x18] sm:$0xf0] %vm110_vm15, %v108_v24  ;;  %vm2645_vm15 = vmor %vm182_vm13, %vm197_vm14 }
  0x87   :  { %v129_v27 = vld [vmem:[#allocation2 + $0x30] sm:$0xf]  ;;  %113 = vst.msk [vmem:[#allocation2 + $0x20] sm:$0xf0] %vm112_vm6, %v108_v24 }
  0x88   :  { %104 = vst.msk [vmem:[#allocation2 + $0x18] sm:$0xf] %vm103_vm7, %v101_v25  ;;  %v2085_v29 = vpack.c.bf16 %v129_v27, %v124_v26  ;;  %vm726_vm7 = vcmask 261120  }
  0x89   :  { %105 = vst.msk [vmem:[#allocation2 + $0x20] sm:$0xf] %vm31_vm1, %v101_v25  ;;  %v115_v31 = vpop.permute.xlu0 %114  ;;  %v130_v37 = vld [vmem:[#allocation2 + $0x38] sm:$0xf]  ;;  %vm145_vm1 = vcmp.lt.s32.totalorder %v135_v47, 129  ;;  %v600_v25 = vld [vmem:[%s3123_s3] sm:$0xff] }
  0x8a   :  { %2087 = vmatprep.subr.msk.bf16.mxu0 %vm2482_vm4, %v2085_v29  ;;  %117 = vst.msk [vmem:[#allocation2 + $0x40] sm:$0xf] %vm80_vm10, %v115_v31  ;;  %vm2552_vm9 = vmor %vm145_vm1, %vm155_vm5  ;;  %vm161_vm10 = vcmp.lt.s32.totalorder %v136_v3, 259  ;;  %vm1322_vm5 = vcmask 1031168  }
  0x8b   :  { %2090 = vmatpush1.bf16.msk.msra.mxu0 %vm2482_vm4, %v2088_v30  ;;  %118 = vst.msk [vmem:[#allocation2 + $0x48] sm:$0xf] %vm82_vm11, %v115_v31  ;;  %v125_v36 = vld [vmem:[#allocation2 + $0x10] sm:$0xff]  ;;  %vm176_vm11 = vcmp.ge.s32.totalorder %v136_v3, 261  ;;  %vm2336_vm3 = vmpackc.low %vm2552_vm9, %vm2552_vm9 }
  0x8c   :  { %v2094_v42 = vpack.c.bf16 %v130_v37, %v125_v36  ;;  %vm2619_vm12 = vmor %vm161_vm10, %vm176_vm11 }
  0x8d   :  { %vm2860_vm1 = vmpackc.low %vm139_vm8, %vm139_vm8 }
  0x8e   :  { %1944 = vmatmul.mubr.msk.f32.vlgmr.msra.gmra.mrb[0].mxu0 %vm238_vm2, %v119_v32 }
  0x8f   :  { %337 = vmatprep.mubr.f32.mxu0 %v2386_v4  ;;  %v126_v34 = vld [vmem:[#allocation2 + $0x18] sm:$0xff] }
  0x90   :  { %v127_v39 = vld [vmem:[#allocation2 + $0x20] sm:$0xff] }
  0x91   :  { %v131_v38 = vld [vmem:[#allocation2 + $0x40] sm:$0xf] }
  0x92   :  { %1945 = vmatmul.mubr.msk.f32.gmra.mrb[2].mxu0 %vm238_vm2, %v120_v33  ;;  %v132_v40 = vld [vmem:[#allocation2 + $0x48] sm:$0xf]  ;;  %v2091_v41 = vpack.c.bf16 %v131_v38, %v126_v34  ;;  %v138_v34 = vadd.s32 512, %v2537_v46 }
  0x93   :  { %343 = vmatprep.mubr.f32.mxu0 %v2386_v4  ;;  %v2097_v43 = vpack.c.bf16 %v132_v40, %v127_v39 }
  0x94   :  { %2093 = vmatprep.subr.msk.bf16.mxu0 %vm2482_vm4, %v2091_v41  ;;  %2175 = vmatprep.subr.msk.bf16.mxu1 %vm2482_vm4, %v2091_v41  ;;  %vm203_vm6 = vcmp.lt.s32.totalorder %v138_v34, 519 }
  0x95   :  { %2096 = vmatpush1.bf16.msk.msra.mxu0 %vm2482_vm4, %v2094_v42  ;;  %2176 = vmatpush1.bf16.msk.msra.mxu1 %vm2482_vm4, %v2094_v42 }
  0x96   :  { %1946 = vmatmul.mubr.msk.f32.gmra.mrb[4].mxu0 %vm238_vm2, %v121_v35  ;;  %2099 = vmatprep.subr.msk.bf16.mxu0 %vm2482_vm4, %v2097_v43  ;;  %v2540_v48 = vpop.permute.xlu1 %220 }
  0x97   :  { %349 = vmatprep.mubr.f32.mxu0 %v2386_v4 }
  0x98   :  { %1952 = vmatmul.mubr.msk.f32.vlgmr.msra.gmra.mrb[0].mxu1 %vm238_vm2, %v121_v35 }
  0x99   :  { %438 = vmatprep.mubr.f32.mxu1 %v2386_v4 }
  0x9a   :  { %1947 = vmatmul.mubr.msk.f32.gmra.mrb[6].mxu0 %vm238_vm2, %v122_v44  ;;  %v2548_v53 = vpop.permute.xlu0 %225  ;;  %v2557_v58 = vpop.permute.xlu1 %230 }
  0x9b   :  { %420 = vmatprep.mubr.f32.mxu0 %v2386_v4 }
  0x9c   :  { %1953 = vmatmul.mubr.msk.f32.gmra.mrb[2].mxu1 %vm238_vm2, %v122_v44 }
  0x9d   :  { %803 = vmatprep.mubr.f32.mxu1 %v2386_v4 }
  0x9e   :  { %1950 = vmatmul.mubr.msk.f32.vlgmr.msra.gmra.mrb[8].mxu0 %vm238_vm2, %v119_v32  ;;  %v2592_v10 = vpop.permute.xlu1 %235 }
  0x9f   :  { %2102 = vmatpush3.bf16.msk.msra.mxu0 %vm2482_vm4, %v2097_v43  ;;  %426 = vmatprep.mubr.f32.mxu0 %v2386_v4  ;;  %vm2339_vm4 = vmpackc.low %vm2645_vm15, %vm2645_vm15 }
  0xa2   :  { %1951 = vmatmul.mubr.msk.f32.gmra.mrb[10].mxu0 %vm238_vm2, %v120_v33 }
  0xa3   :  { %2037 = vmatprep.mubr.msk.f32.mxu0 %vm238_vm2, %v119_v32 }
  0xa6   :  { %2038 = vmatmul.mubr.msk.f32.vlgmr.msra.gmra.mrb[12].mxu0 %vm238_vm2, %v120_v33 }
  0xa7   :  { %2040 = vmatprep.mubr.msk.f32.mxu0 %vm238_vm2, %v121_v35 }
  0xaa   :  { %2041 = vmatmul.mubr.msk.f32.gmra.mrb[14].mxu0 %vm238_vm2, %v122_v44  ;;  %vm2342_vm2 = vmpackc.low %vm2619_vm12, %vm2619_vm12 }
  0xab   :  { %892 = vmatprep.mubr.f32.mxu0 %v2386_v4 }
 0x161   :  { %v333_v49 = vpop.f32.mrb[0].mxu0 }
 0x162   :  { %v335_v50 = vpop.f32.mrb[1].mxu0  ;;  %v2543_v51 = vadd.f32 %v333_v49, %v2540_v48 }
 0x163   :  { %v2546_v52 = vadd.f32 %v335_v50, %v2540_v48 }
 0x164   :  { %v530_v54 = vmax.f32 %v2543_v51, 0.0 }
 0x165   :  { %v339_v56 = vpop.f32.mrb[2].mxu0  ;;  %v531_v57 = vmax.f32 %v2546_v52, 0.0 }
 0x166   :  { %v2560_v59 = vadd.f32 %v339_v56, %v2548_v53  ;;  %v341_v60 = vpop.f32.mrb[3].mxu0  ;;  %v560_v61 = vsel %vm139_vm8, %v530_v54, 0.0 }
 0x167   :  { %v2567_v62 = vadd.f32 %v341_v60, %v2548_v53  ;;  %v561_v63 = vsel %vm2552_vm9, %v531_v57, 0.0 }
 0x168   :  { %v535_v0 = vmax.f32 %v2560_v59, 0.0 }
 0x169   :  { %v536_v1 = vmax.f32 %v2567_v62, 0.0  ;;  %v345_v2 = vpop.f32.mrb[4].mxu0 }
 0x16a   :  { %v2577_v5 = vadd.f32 %v345_v2, %v2557_v58  ;;  %v565_v6 = vsel %vm139_vm8, %v535_v0, 0.0  ;;  %v347_v7 = vpop.f32.mrb[5].mxu0 }
 0x16b   :  { %v2587_v8 = vsel %vm2552_vm9, %v536_v1, 0.0  ;;  %v2590_v9 = vadd.f32 %v347_v7, %v2557_v58  ;;  %v2594_v11 = vpack.i.bf16 %v565_v6, %v560_v61  ;;  %v434_v19 = vpop.f32.mrb[0].mxu1 }
 0x16c   :  { %v540_v12 = vmax.f32 %v2577_v5, 0.0  ;;  %v2616_v22 = vadd.f32 %v434_v19, %v2557_v58  ;;  %v436_v23 = vpop.f32.mrb[1].mxu1 }
 0x16d   :  { %v541_v14 = vmax.f32 %v2590_v9, 0.0  ;;  %v351_v15 = vpop.f32.mrb[6].mxu0  ;;  %2237 = vrot.lane.b32.xlu0 %v2594_v11, %s2395_s1  ;;  %v2624_v26 = vadd.f32 %v436_v23, %v2557_v58 }
 0x16e   :  { %v570_v16 = vsel %vm139_vm8, %v540_v12, 0.0  ;;  %v353_v17 = vpop.f32.mrb[7].mxu0  ;;  %v2606_v18 = vadd.f32 %v351_v15, %v2592_v10  ;;  %v542_v29 = vmax.f32 %v2616_v22, 0.0 }
 0x16f   :  { %v571_v20 = vsel %vm2552_vm9, %v541_v14, 0.0  ;;  %v2613_v21 = vadd.f32 %v353_v17, %v2592_v10  ;;  %v543_v33 = vmax.f32 %v2624_v26, 0.0  ;;  %v440_v39 = vpop.f32.mrb[2].mxu1 }
 0x170   :  { %v3126_v24 = vmax.f32 %v2606_v18, 0.0  ;;  %v572_v36 = vsel %vm2619_vm12, %v542_v29, 0.0  ;;  %v2662_v43 = vadd.f32 %v440_v39, %v2592_v10  ;;  %v442_v44 = vpop.f32.mrb[3].mxu1 }
 0x171   :  { %v546_v27 = vmax.f32 %v2613_v21, 0.0  ;;  %v422_v28 = vpop.f32.mrb[8].mxu0  ;;  %v2659_v42 = vsel %vm2645_vm15, %v543_v33, 0.0  ;;  %v2664_v45 = vpack.i.bf16 %v572_v36, %v571_v20  ;;  %v2668_v50 = vadd.f32 %v442_v44, %v2592_v10 }
 0x172   :  { %v575_v30 = vsel %vm139_vm8, %v3126_v24, 0.0  ;;  %v2633_v31 = vadd.f32 %v422_v28, %v2540_v48  ;;  %v424_v32 = vpop.f32.mrb[9].mxu0  ;;  %v547_v61 = vmax.f32 %v2662_v43, 0.0  ;;  %v3137_v21 = vmax.f32 %v2606_v18, 0.0 }
 0x173   :  { %v576_v35 = vsel %vm2552_vm9, %v546_v27, 0.0  ;;  %v2650_v38 = vadd.f32 %v424_v32, %v2540_v48  ;;  %v2652_v40 = vpack.i.bf16 %v575_v30, %v570_v16  ;;  %v548_v7 = vmax.f32 %v2668_v50, 0.0 }
 0x174   :  { %v532_v41 = vmax.f32 %v2633_v31, 0.0  ;;  %v577_v16 = vsel %vm2619_vm12, %v547_v61, 0.0  ;;  %v2352_v46 = vpack.c.bf16 %v546_v27, %v541_v14  ;;  %v2358_v22 = vpack.c.bf16 %v3137_v21, %v540_v12 }
 0x175   :  { %v533_v47 = vmax.f32 %v2650_v38, 0.0  ;;  %v428_v49 = vpop.f32.mrb[10].mxu0  ;;  %v578_v19 = vsel %vm2645_vm15, %v548_v7, 0.0  ;;  %v2256_v23 = vpack.i.bf16 %v577_v16, %v576_v35  ;;  %v2346_v38 = vpack.c.bf16 %v548_v7, %v543_v33 }
 0x176   :  { %v562_v56 = vsel %vm2619_vm12, %v532_v41, 0.0  ;;  %v2675_v60 = vadd.f32 %v428_v49, %v2548_v53  ;;  %v430_v2 = vpop.f32.mrb[11].mxu0  ;;  %v2281_v32 = vpack.i.bf16 %v578_v19, %v2659_v42  ;;  %vm1831_vm8 = vcmask 1014784  }
 0x177   :  { %v563_v3 = vsel %vm2645_vm15, %v533_v47, 0.0  ;;  %v2683_v6 = vadd.f32 %v430_v2, %v2548_v53  ;;  %v2241_v13 = vpack.i.bf16 %v562_v56, %v561_v63  ;;  %vm1909_vm9 = vcmask 998400  }
 0x178   :  { %v537_v15 = vmax.f32 %v2675_v60, 0.0 }
 0x179   :  { %v538_v17 = vmax.f32 %v2683_v6, 0.0  ;;  %v2039_v20 = vpop.f32.mrb[12].mxu0  ;;  %2242 = vrot.lane.b32.xlu0 %v2241_v13, %s2395_s1  ;;  %v601_v6 = vld [vmem:[%s3123_s3 + $0x8] sm:$0xff] }
 0x17a   :  { %v567_v63 = vsel %vm2619_vm12, %v537_v15, 0.0  ;;  %v517_v28 = vadd.f32 %v2039_v20, %v2548_v53  ;;  %v511_v30 = vpop.f32.mrb[13].mxu0  ;;  %v2343_v37 = vpack.c.bf16 %v537_v15, %v532_v41  ;;  %v2349_v41 = vpack.c.bf16 %v535_v0, %v530_v54 }
 0x17b   :  { %v568_v36 = vsel %vm2645_vm15, %v538_v17, 0.0  ;;  %v512_v39 = vadd.f32 %v511_v30, %v2540_v48  ;;  %v2246_v44 = vpack.i.bf16 %v567_v63, %v2587_v8  ;;  %v2355_v54 = vpack.c.bf16 %v547_v61, %v542_v29 }
 0x17c   :  { %v539_v35 = vmax.f32 %v517_v28, 0.0  ;;  %v2276_v49 = vpack.i.bf16 %v568_v36, %v563_v3 }
 0x17d   :  { %v534_v56 = vmax.f32 %v512_v39, 0.0  ;;  %v2042_v2 = vpop.f32.mrb[14].mxu0  ;;  %2247 = vrot.lane.b32.xlu1 %v2246_v44, %s2395_s1  ;;  %2257 = vrot.lane.b32.xlu0 %v2256_v23, %s2395_s1 }
 0x17e   :  { %v569_v53 = vsel %vm203_vm6, %v539_v35, 0.0  ;;  %v527_v16 = vadd.f32 %v2042_v2, %v2592_v10  ;;  %v521_v20 = vpop.f32.mrb[15].mxu0 }
 0x17f   :  { %589 = vst.msk [vmem:[#allocation3 + $0x48] sm:$0xff] %vm25_vm0, %v569_v53  ;;  %v564_v24 = vsel %vm203_vm6, %v534_v56, 0.0  ;;  %v522_v48 = vadd.f32 %v521_v20, %v2557_v58 }
 0x180   :  { %584 = vst.msk [vmem:[#allocation3 + $0x20] sm:$0xff] %vm25_vm0, %v564_v24  ;;  %v549_v8 = vmax.f32 %v527_v16, 0.0 }
 0x181   :  { %v544_v63 = vmax.f32 %v522_v48, 0.0  ;;  %2252 = vrot.lane.b32.xlu1 %v2664_v45, %s2395_s1 }
 0x182   :  { %v579_v28 = vsel %vm203_vm6, %v549_v8, 0.0 }
 0x183   :  { %599 = vst.msk [vmem:[#allocation3 + $0x98] sm:$0xff] %vm25_vm0, %v579_v28  ;;  %v574_v10 = vsel %vm203_vm6, %v544_v63, 0.0 }
 0x184   :  { %594 = vst.msk [vmem:[#allocation3 + $0x70] sm:$0xff] %vm25_vm0, %v574_v10  ;;  %vm689_vm0 = vcmask 1039360  }
 0x185   :  { %2262 = vrot.lane.b32.xlu1 %v2652_v40, %s2395_s1 }
 0x186   :  { %v613_v30 = vld [vmem:[#allocation3 + $0x48] sm:$0xff] }
 0x187   :  { %v608_v58 = vld [vmem:[#allocation3 + $0x20] sm:$0xff] }
 0x188   :  { %v2266_v39 = vpack.i.bf16 %v613_v30, %v608_v58  ;;  %v2725_v24 = vpack.c.bf16 %v613_v30, %v608_v58  ;;  %v2316_v34 = vpack.i.bf16 %v608_v58, %v563_v3 }
 0x18a   :  { %2267 = vrot.lane.b32.xlu0 %v2266_v39, %s2395_s1  ;;  %v623_v35 = vld [vmem:[#allocation3 + $0x98] sm:$0xff] }
 0x18b   :  { %v618_v56 = vld [vmem:[#allocation3 + $0x70] sm:$0xff] }
 0x18c   :  { %v2271_v2 = vpack.i.bf16 %v623_v35, %v618_v56  ;;  %v2728_v53 = vpack.c.bf16 %v623_v35, %v618_v56 }
 0x18e   :  { %2277 = vrot.lane.b32.xlu0 %v2276_v49, %s2395_s1  ;;  %2272 = vrot.lane.b32.xlu1 %v2271_v2, %s2395_s1  ;;  %v2321_v49 = vpack.i.bf16 %v613_v30, %v568_v36 }
 0x192   :  { %2287 = vrot.lane.b32.xlu0 %v2241_v13, %s2396_s23  ;;  %2282 = vrot.lane.b32.xlu1 %v2281_v32, %s2395_s1  ;;  %v2326_v13 = vpack.i.bf16 %v618_v56, %v2659_v42  ;;  %v1693_v42 = vld [vmem:[%s3124_s4 + $0x18] sm:$0xff] }
 0x196   :  { %2297 = vrot.lane.b32.xlu0 %v2594_v11, %s2396_s23  ;;  %2292 = vrot.lane.b32.xlu1 %v2246_v44, %s2396_s23  ;;  %v1690_v11 = vld [vmem:[%s3124_s4] sm:$0xff] }
 0x19a   :  { %2307 = vrot.lane.b32.xlu0 %v2256_v23, %s2396_s23  ;;  %2302 = vrot.lane.b32.xlu1 %v2664_v45, %s2396_s23  ;;  %v2331_v23 = vpack.i.bf16 %v623_v35, %v578_v19  ;;  %v1692_v45 = vld [vmem:[%s3124_s4 + $0x10] sm:$0xff] }
 0x19e   :  { %2317 = vrot.lane.b32.xlu0 %v2316_v34, %s2396_s23  ;;  %2312 = vrot.lane.b32.xlu1 %v2652_v40, %s2396_s23  ;;  %v1691_v40 = vld [vmem:[%s3124_s4 + $0x8] sm:$0xff] }
 0x1a2   :  { %2327 = vrot.lane.b32.xlu0 %v2326_v13, %s2396_s23  ;;  %2322 = vrot.lane.b32.xlu1 %v2321_v49, %s2396_s23 }
 0x1a6   :  { %1696 = vperm.xlu0 %2235, %v1690_v11   ;;  %2332 = vrot.lane.b32.xlu1 %v2331_v23, %s2396_s23 }
 0x1aa   :  { %1706 = vperm.xlu0 %2235, %v1692_v45   ;;  %1701 = vperm.xlu1 %2234, %v1691_v40  }
 0x1ae   :  { %1773 = vperm.xlu0 %2235, %v1690_v11   ;;  %1711 = vperm.xlu1 %2234, %v1693_v42  }
 0x1b2   :  { %1783 = vperm.xlu0 %2235, %v1692_v45   ;;  %1778 = vperm.xlu1 %2234, %v1691_v40  }
 0x1b6   :  { %1851 = vperm.xlu0 %2235, %v1690_v11   ;;  %1788 = vperm.xlu1 %2234, %v1693_v42  }
 0x1ba   :  { %1861 = vperm.xlu0 %2235, %v1692_v45   ;;  %1856 = vperm.xlu1 %2234, %v1691_v40  }
 0x1be   :  { %1660 = vperm.xlu0 %2235, %v1690_v11   ;;  %1866 = vperm.xlu1 %2234, %v1693_v42  }
 0x1c2   :  { %1670 = vperm.xlu0 %2235, %v1692_v45   ;;  %1665 = vperm.xlu1 %2234, %v1691_v40  }
 0x1c6   :  { %1675 = vperm.xlu1 %2234, %v1693_v42  }
 0x1df   :  { %v2238_v3 = vpop.permute.xlu0 %2237 }
 0x1e0   :  { %v2239_v44 = vunpack.i.l.bf16 %v2238_v3  ;;  %v2240_v48 = vunpack.i.h.bf16 %v2238_v3 }
 0x1eb   :  { %v2243_v19 = vpop.permute.xlu0 %2242 }
 0x1ec   :  { %v2245_v32 = vunpack.i.h.bf16 %v2243_v19  ;;  %v2244_v36 = vunpack.i.l.bf16 %v2243_v19 }
 0x1ee   :  { %v690_v28 = vsel %vm689_vm0, %v2239_v44, %v2244_v36  ;;  %v691_v10 = vsel %vm689_vm0, %v2244_v36, %v2245_v32 }
 0x1ef   :  { %v2248_v16 = vpop.permute.xlu1 %2247  ;;  %v2759_v20 = vpop.permute.xlu0 %2257 }
 0x1f0   :  { %v2250_v8 = vunpack.i.h.bf16 %v2248_v16  ;;  %v2249_v63 = vunpack.i.l.bf16 %v2248_v16  ;;  %v2260_v58 = vunpack.i.h.bf16 %v2759_v20  ;;  %v2259_v39 = vunpack.i.l.bf16 %v2759_v20 }
 0x1f2   :  { %v694_v30 = vsel %vm689_vm0, %v2240_v48, %v2249_v63  ;;  %v695_v35 = vsel %vm689_vm0, %v2249_v63, %v2250_v8  ;;  %v703_v23 = vsel %vm689_vm0, %v2259_v39, %v2260_v58  ;;  %v1959_v63 = vld [vmem:[%s3123_s3 + $0x20] sm:$0xff] }
 0x1f3   :  { %v2105_v56 = vpack.c.bf16 %v694_v30, %v690_v28  ;;  %v2253_v2 = vpop.permute.xlu1 %2252  ;;  %v2103_v34 = vpack.c.bf16 %v695_v35, %v691_v10 }
 0x1f4   :  { %v2255_v13 = vunpack.i.h.bf16 %v2253_v2  ;;  %v2254_v49 = vunpack.i.l.bf16 %v2253_v2 }
 0x1f5   :  { %2104 = vmatprep.subr.bf16.mxu1 %v2103_v34 }
 0x1f6   :  { %2106 = vmatpush1.bf16.msra.mxu1 %v2105_v56  ;;  %v699_v11 = vsel %vm689_vm0, %v2254_v49, %v2255_v13 }
 0x1f7   :  { %v2263_v45 = vpop.permute.xlu1 %2262  ;;  %v2107_v40 = vpack.c.bf16 %v703_v23, %v699_v11 }
 0x1f8   :  { %v2265_v42 = vunpack.i.h.bf16 %v2263_v45  ;;  %v2264_v3 = vunpack.i.l.bf16 %v2263_v45 }
 0x1f9   :  { %2108 = vmatprep.subr.bf16.mxu1 %v2107_v40 }
 0x1fa   :  { %v698_v19 = vsel %vm689_vm0, %v2264_v3, %v2254_v49  ;;  %v702_v36 = vsel %vm689_vm0, %v2265_v42, %v2259_v39  ;;  %v1960_v39 = vld [vmem:[%s3123_s3 + $0x28] sm:$0xff] }
 0x1fb   :  { %v2109_v44 = vpack.c.bf16 %v702_v36, %v698_v19 }
 0x1fc   :  { %v2268_v16 = vpop.permute.xlu0 %2267 }
 0x1fd   :  { %v2270_v20 = vunpack.i.h.bf16 %v2268_v16  ;;  %v2269_v48 = vunpack.i.l.bf16 %v2268_v16  ;;  %2110 = vmatpush1.bf16.msra.mxu1 %v2109_v44 }
 0x1ff   :  { %v2119_v28 = vpack.c.bf16 %v2270_v20, %v2269_v48 }
 0x200   :  { %v2278_v10 = vpop.permute.xlu0 %2277  ;;  %v2273_v30 = vpop.permute.xlu1 %2272  ;;  %1963 = vmatmul.mubr.msk.f32.vlgmr.msra.gmra.mrb[4].mxu1 %vm726_vm7, %v1959_v63 }
 0x201   :  { %v2280_v35 = vunpack.i.h.bf16 %v2278_v10  ;;  %v2279_v56 = vunpack.i.l.bf16 %v2278_v10  ;;  %v2275_v2 = vunpack.i.h.bf16 %v2273_v30  ;;  %v2274_v34 = vunpack.i.l.bf16 %v2273_v30  ;;  %2120 = vmatprep.subr.bf16.mxu1 %v2119_v28  ;;  %809 = vmatprep.mubr.f32.mxu1 %v2386_v4 }
 0x202   :  { %2122 = vmatpush3.bf16.msra.mxu1 %v2119_v28 }
 0x203   :  { %v696_v49 = vsel %vm689_vm0, %v2250_v8, %v2280_v35  ;;  %v692_v11 = vsel %vm689_vm0, %v2245_v32, %v2279_v56  ;;  %v2123_v23 = vpack.c.bf16 %v2275_v2, %v2274_v34  ;;  %v693_v45 = vsel %vm689_vm0, %v2279_v56, %v2269_v48  ;;  %v2790_v32 = vld [vmem:[%s3123_s3 + $0x30] sm:$0xff] }
 0x204   :  { %v2113_v40 = vpack.c.bf16 %v696_v49, %v692_v11  ;;  %v2782_v42 = vpop.permute.xlu0 %2287  ;;  %v697_v3 = vsel %vm689_vm0, %v2280_v35, %v2270_v20  ;;  %v2283_v19 = vpop.permute.xlu1 %2282  ;;  %1964 = vmatmul.mubr.msk.f32.gmra.mrb[6].mxu1 %vm726_vm7, %v1960_v39  ;;  %v2337_v48 = vpack.c.bf16 %v536_v1, %v531_v57  ;;  %v2818_v57 = vld [vmem:[%s3123_s3 + $0x38] sm:$0xff]  ;;  %v2340_v35 = vpack.c.bf16 %v538_v17, %v533_v47 }
 0x205   :  { %v2111_v36 = vpack.c.bf16 %v697_v3, %v693_v45  ;;  %v2285_v44 = vunpack.i.h.bf16 %v2283_v19  ;;  %2124 = vmatprep.subr.bf16.mxu1 %v2123_v23  ;;  %815 = vmatprep.mubr.f32.mxu1 %v2386_v4  ;;  %v2284_v8 = vunpack.i.l.bf16 %v2283_v19  ;;  %v2290_v12 = vunpack.i.h.bf16 %v2782_v42  ;;  %v602_v45 = vld [vmem:[%s3123_s3 + $0x10] sm:$0xff] }
 0x206   :  { %2126 = vmatpush3.bf16.msra.mxu1 %v2123_v23  ;;  %v2289_v18 = vunpack.i.l.bf16 %v2782_v42 }
 0x207   :  { %2112 = vmatprep.subr.bf16.mxu0 %v2111_v36  ;;  %v704_v16 = vsel %vm689_vm0, %v2260_v58, %v2285_v44  ;;  %v705_v20 = vsel %vm689_vm0, %v2285_v44, %v2275_v2  ;;  %2338 = vmatprep.subr.msk.bf16.mxu1 %vm2336_vm3, %v2337_v48  ;;  %v700_v28 = vsel %vm689_vm0, %v2255_v13, %v2284_v8 }
 0x208   :  { %2114 = vmatpush1.bf16.msra.mxu0 %v2113_v40  ;;  %v2807_v58 = vpop.permute.xlu0 %2297  ;;  %v2809_v10 = vpop.permute.xlu1 %2292  ;;  %v701_v30 = vsel %vm689_vm0, %v2284_v8, %v2274_v34  ;;  %1965 = vmatmul.mubr.msk.f32.gmra.mrb[8].mxu1 %vm726_vm7, %v2790_v32  ;;  %v2117_v52 = vpack.c.bf16 %v704_v16, %v700_v28  ;;  %v603_v8 = vld [vmem:[%s3123_s3 + $0x18] sm:$0xff] }
 0x209   :  { %821 = vmatprep.mubr.f32.mxu1 %v2386_v4  ;;  %v2115_v62 = vpack.c.bf16 %v705_v20, %v701_v30  ;;  %v2295_v0 = vunpack.i.h.bf16 %v2809_v10  ;;  %v2294_v9 = vunpack.i.l.bf16 %v2809_v10  ;;  %v2300_v3 = vunpack.i.h.bf16 %v2807_v58 }
 0x20b   :  { %2116 = vmatprep.subr.bf16.mxu0 %v2115_v62  ;;  %v1328_v7 = vsel %vm1322_vm5, %v2294_v9, %v2295_v0  ;;  %v1327_v20 = vsel %vm1322_vm5, %v2300_v3, %v2294_v9 }
 0x20c   :  { %v2820_v1 = vpop.permute.xlu0 %2307  ;;  %v2822_v13 = vpop.permute.xlu1 %2302  ;;  %1966 = vmatmul.mubr.msk.f32.gmra.mrb[10].mxu1 %vm726_vm7, %v2818_v57  ;;  %2118 = vmatpush1.bf16.msra.mxu0 %v2117_v52 }
 0x20d   :  { %2051 = vmatprep.mubr.msk.f32.mxu1 %vm726_vm7, %v1959_v63  ;;  %2341 = vmatprep.subr.msk.bf16.mxu0 %vm2339_vm4, %v2340_v35  ;;  %v2305_v40 = vunpack.i.h.bf16 %v2822_v13  ;;  %v2309_v36 = vunpack.i.l.bf16 %v2820_v1  ;;  %v2304_v44 = vunpack.i.l.bf16 %v2822_v13  ;;  %v1987_v13 = vld [vmem:[%s3123_s3 + $0x40] sm:$0xff] }
 0x20f   :  { %1967 = vmatmul.mubr.msk.f32.vlgmr.msra.gmra.mrb[16].mxu0 %vm726_vm7, %v1959_v63 }
 0x210   :  { %v2834_v56 = vpop.permute.xlu0 %2317  ;;  %v2837_v2 = vpop.permute.xlu1 %2312  ;;  %2052 = vmatmul.mubr.msk.f32.vlgmr.msra.gmra.mrb[12].mxu1 %vm726_vm7, %v1960_v39  ;;  %2344 = vmatpush1.bf16.msk.msra.mxu0 %vm2342_vm2, %v2343_v37  ;;  %v1989_v37 = vld [vmem:[%s3123_s3 + $0x50] sm:$0xff] }
 0x211   :  { %898 = vmatprep.mubr.f32.mxu0 %v2386_v4  ;;  %2347 = vmatprep.subr.msk.bf16.mxu0 %vm2339_vm4, %v2346_v38  ;;  %v2320_v26 = vunpack.i.h.bf16 %v2834_v56  ;;  %v2319_v33 = vunpack.i.l.bf16 %v2834_v56  ;;  %v2315_v48 = vunpack.i.h.bf16 %v2837_v2  ;;  %v2314_v28 = vunpack.i.l.bf16 %v2837_v2  ;;  %v1988_v2 = vld [vmem:[%s3123_s3 + $0x48] sm:$0xff]  ;;  %v1990_v38 = vld [vmem:[%s3123_s3 + $0x58] sm:$0xff]  ;;  %s2397_s3 = smov 124  }
 0x212   :  { %2350 = vmatpush1.bf16.msk.msra.mxu1 %vm2860_vm1, %v2349_v41  ;;  %2054 = vmatprep.mubr.msk.f32.mxu1 %vm726_vm7, %v2790_v32 }
 0x213   :  { %2353 = vmatprep.subr.msk.bf16.mxu1 %vm2336_vm3, %v2352_v46  ;;  %1968 = vmatmul.mubr.msk.f32.gmra.mrb[18].mxu0 %vm726_vm7, %v1960_v39  ;;  %v1326_v27 = vsel %vm1322_vm5, %v2319_v33, %v2320_v26  ;;  %v2310_v39 = vunpack.i.h.bf16 %v2820_v1  ;;  %v1325_v49 = vsel %vm1322_vm5, %v2290_v12, %v2319_v33  ;;  %v1331_v52 = vsel %vm1322_vm5, %v2314_v28, %v2304_v44 }
 0x214   :  { %v2884_v51 = vpop.permute.xlu1 %2322  ;;  %2055 = vmatmul.mubr.msk.f32.gmra.mrb[14].mxu1 %vm726_vm7, %v2818_v57  ;;  %2356 = vmatpush1.bf16.msk.msra.mxu0 %vm2342_vm2, %v2355_v54  ;;  %v2902_v14 = vpop.permute.xlu0 %2327 }
 0x215   :  { %v2325_v55 = vunpack.i.h.bf16 %v2884_v51  ;;  %v2324_v59 = vunpack.i.l.bf16 %v2884_v51  ;;  %904 = vmatprep.mubr.f32.mxu0 %v2386_v4  ;;  %1078 = vmatprep.mubr.f32.mxu1 %v2386_v4  ;;  %v2330_v47 = vunpack.i.h.bf16 %v2902_v14  ;;  %v2329_v50 = vunpack.i.l.bf16 %v2902_v14 }
 0x216   :  { %2359 = vmatpush1.bf16.msk.msra.mxu1 %vm2860_vm1, %v2358_v22  ;;  %v1336_v10 = vsel %vm1322_vm5, %v2309_v36, %v2310_v39 }
 0x217   :  { %2144 = vmatprep.subr.bf16.mxu1 %v2725_v24  ;;  %v1330_v5 = vsel %vm1322_vm5, %v2324_v59, %v2325_v55  ;;  %1969 = vmatmul.mubr.msk.f32.gmra.mrb[20].mxu0 %vm726_vm7, %v2790_v32  ;;  %v1329_v17 = vsel %vm1322_vm5, %v2295_v0, %v2324_v59  ;;  %v1334_v63 = vsel %vm1322_vm5, %v2329_v50, %v2330_v47 }
 0x218   :  { %v2925_v29 = vpop.permute.xlu1 %2332  ;;  %v2159_v43 = vpack.c.bf16 %v1330_v5, %v1326_v27  ;;  %910 = vmatprep.mubr.f32.mxu0 %v2386_v4  ;;  %v2161_v23 = vpack.c.bf16 %v1329_v17, %v1325_v49  ;;  %v1333_v19 = vsel %vm1322_vm5, %v2305_v40, %v2329_v50  ;;  %v2167_v35 = vpack.c.bf16 %v2325_v55, %v2320_v26 }
 0x219   :  { %v2335_v60 = vunpack.i.h.bf16 %v2925_v29  ;;  %v2334_v61 = vunpack.i.l.bf16 %v2925_v29  ;;  %1975 = vmatmul.mubr.msk.f32.vlgmr.msra.gmra.mrb[4].mxu1 %vm726_vm7, %v600_v25 }
 0x21a   :  { %2160 = vmatprep.subr.bf16.mxu0 %v2159_v43  ;;  %2146 = vmatpush3.bf16.msra.mxu1 %v2725_v24  ;;  %v1324_v24 = vsel %vm1322_vm5, %v2289_v18, %v2290_v12 }
 0x21b   :  { %2148 = vmatprep.subr.bf16.mxu1 %v2728_v53  ;;  %v1338_v15 = vsel %vm1322_vm5, %v2334_v61, %v2335_v60  ;;  %1084 = vmatprep.mubr.f32.mxu1 %v2386_v4  ;;  %v2151_v34 = vpack.c.bf16 %v1328_v7, %v1324_v24  ;;  %v1337_v42 = vsel %vm1322_vm5, %v2310_v39, %v2334_v61 }
 0x21c   :  { %1970 = vmatmul.mubr.msk.f32.gmra.mrb[22].mxu0 %vm726_vm7, %v2818_v57  ;;  %v2163_v11 = vpack.c.bf16 %v1338_v15, %v1334_v63  ;;  %v2165_v32 = vpack.c.bf16 %v1337_v42, %v1333_v19  ;;  %v1335_v57 = vsel %vm1322_vm5, %v2315_v48, %v2309_v36  ;;  %v2171_v56 = vpack.c.bf16 %v2335_v60, %v2330_v47 }
 0x21d   :  { %1167 = vmatprep.mubr.f32.mxu0 %v2386_v4  ;;  %1976 = vmatmul.mubr.msk.f32.gmra.mrb[6].mxu1 %vm726_vm7, %v601_v6  ;;  %v2157_v1 = vpack.c.bf16 %v1335_v57, %v1331_v52 }
 0x21e   :  { %2150 = vmatpush3.bf16.msra.mxu1 %v2728_v53  ;;  %1090 = vmatprep.mubr.f32.mxu1 %v2386_v4  ;;  %v2299_v53 = vunpack.i.l.bf16 %v2807_v58  ;;  %v1332_v58 = vsel %vm1322_vm5, %v2304_v44, %v2305_v40 }
 0x21f   :  { %2152 = vmatprep.subr.bf16.mxu1 %v2151_v34  ;;  %v2155_v62 = vpack.c.bf16 %v1336_v10, %v1332_v58 }
 0x220   :  { %1979 = vmatmul.mubr.msk.f32.vlgmr.msra.gmra.mrb[16].mxu0 %vm726_vm7, %v600_v25  ;;  %v1323_v16 = vsel %vm1322_vm5, %v2299_v53, %v2289_v18 }
 0x221   :  { %2162 = vmatpush1.bf16.msra.mxu0 %v2161_v23  ;;  %1173 = vmatprep.mubr.f32.mxu0 %v2386_v4  ;;  %v2153_v30 = vpack.c.bf16 %v1327_v20, %v1323_v16 }
 0x222   :  { %2164 = vmatprep.subr.bf16.mxu0 %v2163_v11  ;;  %1977 = vmatmul.mubr.msk.f32.gmra.mrb[8].mxu1 %vm726_vm7, %v602_v45 }
 0x223   :  { %1096 = vmatprep.mubr.f32.mxu1 %v2386_v4 }
 0x224   :  { %1980 = vmatmul.mubr.msk.f32.gmra.mrb[18].mxu0 %vm726_vm7, %v601_v6 }
 0x225   :  { %2166 = vmatpush1.bf16.msra.mxu0 %v2165_v32  ;;  %1179 = vmatprep.mubr.f32.mxu0 %v2386_v4  ;;  %v3031_v31 = vpop.permute.xlu0 %1696 }
 0x226   :  { %1978 = vmatmul.mubr.msk.f32.gmra.mrb[10].mxu1 %vm726_vm7, %v603_v8 }
 0x227   :  { %2065 = vmatprep.mubr.msk.f32.mxu1 %vm726_vm7, %v600_v25 }
 0x228   :  { %1981 = vmatmul.mubr.msk.f32.gmra.mrb[20].mxu0 %vm726_vm7, %v602_v45 }
 0x229   :  { %1185 = vmatprep.mubr.f32.mxu0 %v2386_v4  ;;  %v3033_v41 = vpop.permute.xlu1 %1701  ;;  %v3035_v26 = vpop.permute.xlu0 %1706 }
 0x22a   :  { %2066 = vmatmul.mubr.msk.f32.vlgmr.msra.gmra.mrb[12].mxu1 %vm726_vm7, %v601_v6 }
 0x22b   :  { %2154 = vmatpush1.bf16.msra.mxu1 %v2153_v30  ;;  %2068 = vmatprep.mubr.msk.f32.mxu1 %vm726_vm7, %v602_v45 }
 0x22c   :  { %1982 = vmatmul.mubr.msk.f32.gmra.mrb[22].mxu0 %vm726_vm7, %v603_v8  ;;  %2156 = vmatprep.subr.bf16.mxu1 %v2155_v62 }
 0x22d   :  { %1524 = vmatprep.mubr.f32.mxu0 %v2386_v4  ;;  %v3037_v33 = vpop.permute.xlu1 %1711 }
 0x22e   :  { %2069 = vmatmul.mubr.msk.f32.gmra.mrb[14].mxu1 %vm726_vm7, %v603_v8 }
 0x22f   :  { %2158 = vmatpush1.bf16.msra.mxu1 %v2157_v1  ;;  %1435 = vmatprep.mubr.f32.mxu1 %v2386_v4 }
 0x230   :  { %1995 = vmatmul.mubr.msk.f32.vlgmr.msra.gmra.mrb[16].mxu0 %vm726_vm7, %v1987_v13  ;;  %2168 = vmatprep.subr.bf16.mxu1 %v2167_v35 }
 0x231   :  { %1530 = vmatprep.mubr.f32.mxu0 %v2386_v4  ;;  %v1779_v46 = vpop.permute.xlu1 %1778 }
 0x232   :  { %1991 = vmatmul.mubr.msk.f32.vlgmr.msra.gmra.mrb[4].mxu1 %vm726_vm7, %v1987_v13 }
 0x233   :  { %2170 = vmatpush3.bf16.msra.mxu1 %v2167_v35  ;;  %1441 = vmatprep.mubr.f32.mxu1 %v2386_v4 }
 0x234   :  { %1996 = vmatmul.mubr.msk.f32.gmra.mrb[18].mxu0 %vm726_vm7, %v1988_v2  ;;  %2172 = vmatprep.subr.bf16.mxu1 %v2171_v56 }
 0x235   :  { %1536 = vmatprep.mubr.f32.mxu0 %v2386_v4  ;;  %v3041_v54 = vpop.permute.xlu1 %1788 }
 0x236   :  { %1992 = vmatmul.mubr.msk.f32.gmra.mrb[6].mxu1 %vm726_vm7, %v1988_v2 }
 0x237   :  { %2174 = vmatpush3.bf16.msra.mxu1 %v2171_v56  ;;  %1447 = vmatprep.mubr.f32.mxu1 %v2386_v4 }
 0x238   :  { %1997 = vmatmul.mubr.msk.f32.gmra.mrb[20].mxu0 %vm726_vm7, %v1989_v37 }
 0x239   :  { %1542 = vmatprep.mubr.f32.mxu0 %v2386_v4  ;;  %v3045_v59 = vpop.permute.xlu1 %1856 }
 0x23a   :  { %1993 = vmatmul.mubr.msk.f32.gmra.mrb[8].mxu1 %vm726_vm7, %v1989_v37 }
 0x23b   :  { %1453 = vmatprep.mubr.f32.mxu1 %v2386_v4  ;;  %v1774_v4 = vpop.permute.xlu0 %1773 }
 0x23c   :  { %1998 = vmatmul.mubr.msk.f32.gmra.mrb[22].mxu0 %vm726_vm7, %v1990_v38 }
 0x23d   :  { %v3049_v9 = vpop.permute.xlu1 %1866 }
 0x23e   :  { %1994 = vmatmul.mubr.msk.f32.gmra.mrb[10].mxu1 %vm726_vm7, %v1990_v38 }
 0x23f   :  { %2079 = vmatprep.mubr.msk.f32.mxu1 %vm726_vm7, %v1987_v13  ;;  %v3039_v51 = vpop.permute.xlu0 %1783 }
 0x241   :  { %v1666_v7 = vpop.permute.xlu1 %1665 }
 0x242   :  { %2080 = vmatmul.mubr.msk.f32.vlgmr.msra.gmra.mrb[12].mxu1 %vm726_vm7, %v1988_v2 }
 0x243   :  { %2082 = vmatprep.mubr.msk.f32.mxu1 %vm726_vm7, %v1989_v37  ;;  %v3043_v55 = vpop.permute.xlu0 %1851 }
 0x245   :  { %v1676_v48 = vpop.permute.xlu1 %1675 }
 0x246   :  { %2083 = vmatmul.mubr.msk.f32.gmra.mrb[14].mxu1 %vm726_vm7, %v1990_v38 }
 0x247   :  { %v3047_v0 = vpop.permute.xlu0 %1861 }
 0x24b   :  { %v1661_v27 = vpop.permute.xlu0 %1660 }
 0x24f   :  { %v1671_v40 = vpop.permute.xlu0 %1670 }
 0x303   :  { %v1526_v14 = vpop.f32.mrb[16].mxu0 }
 0x304   :  { %v1715_v21 = vadd.f32 %v3031_v31, %v1526_v14  ;;  %v1791_v22 = vadd.f32 %v1774_v4, %v1526_v14  ;;  %v1528_v25 = vpop.f32.mrb[17].mxu0 }
 0x305   :  { %v1792_v5 = vadd.f32 %v1774_v4, %v1528_v25  ;;  %v1437_v12 = vpop.f32.mrb[4].mxu1  ;;  %v1869_v43 = vadd.f32 %v3043_v55, %v1528_v25 }
 0x306   :  { %v1723_v18 = vmax.f32 %v1715_v21, 0.0  ;;  %v1799_v29 = vmax.f32 %v1791_v22, 0.0  ;;  %v1678_v47 = vadd.f32 %v1661_v27, %v1437_v12  ;;  %v1439_v50 = vpop.f32.mrb[5].mxu1 }
 0x307   :  { %v1532_v60 = vpop.f32.mrb[18].mxu0  ;;  %v1800_v15 = vmax.f32 %v1792_v5, 0.0  ;;  %v1877_v24 = vmax.f32 %v1869_v43, 0.0 }
 0x308   :  { %1815 = vrot.lane.b32.xlu0 %v1799_v29, %s2397_s3  ;;  %1740 = vrot.lane.b32.xlu1 %v1723_v18, %s2396_s23  ;;  %v1534_v61 = vpop.f32.mrb[19].mxu0  ;;  %v1682_v6 = vmax.f32 %v1678_v47, 0.0  ;;  %v1717_v63 = vadd.f32 %v3033_v41, %v1532_v60  ;;  %v1793_v34 = vadd.f32 %v1779_v46, %v1532_v60 }
 0x309   :  { %v1443_v17 = vpop.f32.mrb[6].mxu1  ;;  %v1794_v42 = vadd.f32 %v1779_v46, %v1534_v61  ;;  %v1871_v36 = vadd.f32 %v3045_v59, %v1534_v61  ;;  %v1714_v46 = vadd.f32 %v3031_v31, %v1439_v50 }
 0x30a   :  { %1686 = vst [vmem:[#allocation4] sm:$0xff] %v1682_v6  ;;  %v1679_v39 = vadd.f32 %v1666_v7, %v1443_v17  ;;  %v1445_v49 = vpop.f32.mrb[7].mxu1  ;;  %v1725_v53 = vmax.f32 %v1717_v63, 0.0  ;;  %v1801_v19 = vmax.f32 %v1793_v34, 0.0 }
 0x30b   :  { %v1538_v11 = vpop.f32.mrb[20].mxu0  ;;  %v1802_v28 = vmax.f32 %v1794_v42, 0.0  ;;  %v1879_v10 = vmax.f32 %v1871_v36, 0.0  ;;  %v1716_v31 = vadd.f32 %v3033_v41, %v1445_v49 }
 0x30c   :  { %1893 = vrot.lane.b32.xlu0 %v1877_v24, %s2398_s29  ;;  %1817 = vrot.lane.b32.xlu1 %v1800_v15, %s2397_s3  ;;  %v1540_v23 = vpop.f32.mrb[21].mxu0  ;;  %v1683_v45 = vmax.f32 %v1679_v39, 0.0  ;;  %v1719_v30 = vadd.f32 %v3035_v26, %v1538_v11  ;;  %v1795_v52 = vadd.f32 %v3039_v51, %v1538_v11 }
 0x30d   :  { %v1449_v3 = vpop.f32.mrb[8].mxu1  ;;  %v1796_v56 = vadd.f32 %v3039_v51, %v1540_v23  ;;  %v1873_v37 = vadd.f32 %v3047_v0, %v1540_v23  ;;  %v1722_v51 = vmax.f32 %v1714_v46, 0.0  ;;  %v1724_v47 = vmax.f32 %v1716_v31, 0.0 }
 0x30e   :  { %1687 = vst [vmem:[#allocation4 + $0x8] sm:$0xff] %v1683_v45  ;;  %v1680_v44 = vadd.f32 %v1671_v40, %v1449_v3  ;;  %v1451_v32 = vpop.f32.mrb[9].mxu1  ;;  %v1727_v35 = vmax.f32 %v1719_v30, 0.0  ;;  %v1803_v2 = vmax.f32 %v1795_v52, 0.0 }
 0x30f   :  { %v1544_v8 = vpop.f32.mrb[22].mxu0  ;;  %v1804_v14 = vmax.f32 %v1796_v56, 0.0  ;;  %v1881_v21 = vmax.f32 %v1873_v37, 0.0  ;;  %v1718_v50 = vadd.f32 %v3035_v26, %v1451_v32 }
 0x310   :  { %1819 = vrot.lane.b32.xlu0 %v1801_v19, %s2397_s3  ;;  %1744 = vrot.lane.b32.xlu1 %v1725_v53, %s2396_s23  ;;  %v1546_v16 = vpop.f32.mrb[23].mxu0  ;;  %v1684_v20 = vmax.f32 %v1680_v44, 0.0  ;;  %v1721_v22 = vadd.f32 %v3037_v33, %v1544_v8  ;;  %v1797_v5 = vadd.f32 %v3041_v54, %v1544_v8 }
 0x311   :  { %v1455_v58 = vpop.f32.mrb[10].mxu1  ;;  %v1798_v12 = vadd.f32 %v3041_v54, %v1546_v16  ;;  %v1726_v61 = vmax.f32 %v1718_v50, 0.0  ;;  %v1875_v7 = vadd.f32 %v3049_v9, %v1546_v16 }
 0x312   :  { %1688 = vst [vmem:[#allocation4 + $0x10] sm:$0xff] %v1684_v20  ;;  %v1681_v57 = vadd.f32 %v1676_v48, %v1455_v58  ;;  %v1457_v62 = vpop.f32.mrb[11].mxu1  ;;  %v1729_v27 = vmax.f32 %v1721_v22, 0.0  ;;  %v1805_v18 = vmax.f32 %v1797_v5, 0.0 }
 0x313   :  { %v1806_v29 = vmax.f32 %v1798_v12, 0.0  ;;  %v1720_v41 = vadd.f32 %v3037_v33, %v1457_v62  ;;  %v1883_v17 = vmax.f32 %v1875_v7, 0.0 }
 0x314   :  { %1897 = vrot.lane.b32.xlu0 %v1879_v10, %s2398_s29  ;;  %1821 = vrot.lane.b32.xlu1 %v1802_v28, %s2397_s3  ;;  %v1685_v1 = vmax.f32 %v1681_v57, 0.0 }
 0x315   :  { %v2081_v13 = vpop.f32.mrb[12].mxu1  ;;  %v1728_v26 = vmax.f32 %v1720_v41, 0.0 }
 0x316   :  { %1689 = vst [vmem:[#allocation4 + $0x18] sm:$0xff] %v1685_v1  ;;  %v1615_v38 = vpop.f32.mrb[13].mxu1  ;;  %v1872_v43 = vadd.f32 %v2081_v13, %v3045_v59 }
 0x317   :  { %v1870_v54 = vadd.f32 %v3043_v55, %v1615_v38 }
 0x318   :  { %1823 = vrot.lane.b32.xlu0 %v1803_v2, %s2397_s3  ;;  %1748 = vrot.lane.b32.xlu1 %v1727_v35, %s2396_s23  ;;  %v1880_v60 = vmax.f32 %v1872_v43, 0.0 }
 0x319   :  { %v2084_v4 = vpop.f32.mrb[14].mxu1  ;;  %v1878_v6 = vmax.f32 %v1870_v54, 0.0 }
 0x31a   :  { %v1625_v25 = vpop.f32.mrb[15].mxu1  ;;  %v1876_v15 = vadd.f32 %v2084_v4, %v3049_v9 }
 0x31b   :  { %v1874_v59 = vadd.f32 %v3047_v0, %v1625_v25 }
 0x31c   :  { %1901 = vrot.lane.b32.xlu0 %v1881_v21, %s2398_s29  ;;  %1825 = vrot.lane.b32.xlu1 %v1804_v14, %s2397_s3  ;;  %v1884_v24 = vmax.f32 %v1876_v15, 0.0 }
 0x31d   :  { %v1882_v55 = vmax.f32 %v1874_v59, 0.0 }
 0x320   :  { %1752 = vrot.lane.b32.xlu1 %v1729_v27, %s2396_s23  ;;  %1738 = vrot.lane.b32.xlu0 %v1722_v51, %s2396_s23 }
 0x324   :  { %1829 = vrot.lane.b32.xlu1 %v1806_v29, %s2397_s3  ;;  %1827 = vrot.lane.b32.xlu0 %v1805_v18, %s2397_s3 }
 0x328   :  { %1742 = vrot.lane.b32.xlu0 %v1724_v47, %s2396_s23  ;;  %1899 = vrot.lane.b32.xlu1 %v1880_v60, %s2398_s29 }
 0x32c   :  { %1746 = vrot.lane.b32.xlu0 %v1726_v61, %s2396_s23  ;;  %1895 = vrot.lane.b32.xlu1 %v1878_v6, %s2398_s29 }
 0x330   :  { %1750 = vrot.lane.b32.xlu0 %v1728_v26, %s2396_s23  ;;  %1903 = vrot.lane.b32.xlu1 %v1882_v55, %s2398_s29  ;;  %s2399_s23 = smov [#allocation4]  }
 0x331   :  { %s1928_s30 = sshll.u32 %s2399_s23, 4  ;;  %s1929_s30 = int_to_ptr.vmem [resolvable:$true] %s1928_s30 }
 0x332   :  { %s2360_s6 = scalar_lea.vmem %s1929_s30, 2048  ;;  %p2365_p1 = scmp.lt.s32.totalorder %s1929_s30, %s1929_s30 }
 0x333   :  { %p2361_p0 = scmp.ne.s32.totalorder %s1929_s30, %s2360_s6  ;;  %p2366_p2 = scmp.lt.s32.totalorder %s2360_s6, %s2360_s6 }
 0x334   :  { %1905 = vrot.lane.b32.xlu0 %v1883_v17, %s2398_s29  ;;  %1907 = vrot.lane.b32.xlu1 %v1884_v24, %s2398_s29 }
 0x335   :  { %p2367_p3 = por %p2366_p2, %p2365_p1 }
 0x337   :  { %p2368_p4 = pnand %p2367_p3, %p2361_p0 }
 0x37a   :  { %v1816_v33 = vpop.permute.xlu0 %1815  ;;  %v1741_v0 = vpop.permute.xlu1 %1740 }
 0x37e   :  { %v1894_v63 = vpop.permute.xlu0 %1893  ;;  %v1818_v34 = vpop.permute.xlu1 %1817 }
 0x37f   :  { %v1832_v39 = vsel %vm1831_vm8, %v1816_v33, %v1818_v34 }
 0x380   :  { %1841 = vst [vmem:[#allocation4 + $0x40] sm:$0xff] %v1832_v39 }
 0x382   :  { %v1820_v9 = vpop.permute.xlu0 %1819  ;;  %v1745_v49 = vpop.permute.xlu1 %1744 }
 0x386   :  { %v1898_v11 = vpop.permute.xlu0 %1897  ;;  %v1822_v23 = vpop.permute.xlu1 %1821 }
 0x387   :  { %v1833_v45 = vsel %vm1831_vm8, %v1820_v9, %v1822_v23 }
 0x388   :  { %1842 = vst [vmem:[#allocation4 + $0x48] sm:$0xff] %v1833_v45 }
 0x38a   :  { %v1824_v40 = vpop.permute.xlu0 %1823  ;;  %v1749_v42 = vpop.permute.xlu1 %1748 }
 0x38e   :  { %v1902_v3 = vpop.permute.xlu0 %1901  ;;  %v1826_v53 = vpop.permute.xlu1 %1825 }
 0x38f   :  { %v1834_v19 = vsel %vm1831_vm8, %v1824_v40, %v1826_v53 }
 0x390   :  { %1843 = vst [vmem:[#allocation4 + $0x50] sm:$0xff] %v1834_v19 }
 0x392   :  { %v1753_v36 = vpop.permute.xlu1 %1752  ;;  %v1739_v44 = vpop.permute.xlu0 %1738 }
 0x393   :  { %v1754_v32 = vsel %vm1322_vm5, %v1739_v44, %v1741_v0 }
 0x394   :  { %1763 = vst [vmem:[#allocation4 + $0x20] sm:$0xff] %v1754_v32 }
 0x396   :  { %v1830_v8 = vpop.permute.xlu1 %1829  ;;  %v1828_v16 = vpop.permute.xlu0 %1827 }
 0x397   :  { %v1835_v20 = vsel %vm1831_vm8, %v1828_v16, %v1830_v8 }
 0x398   :  { %1844 = vst [vmem:[#allocation4 + $0x58] sm:$0xff] %v1835_v20 }
 0x39a   :  { %v1743_v48 = vpop.permute.xlu0 %1742  ;;  %v1900_v28 = vpop.permute.xlu1 %1899 }
 0x39b   :  { %v1755_v58 = vsel %vm1322_vm5, %v1743_v48, %v1745_v49  ;;  %v1911_v10 = vsel %vm1909_vm9, %v1898_v11, %v1900_v28 }
 0x39c   :  { %1764 = vst [vmem:[#allocation4 + $0x28] sm:$0xff] %v1755_v58  ;;  %1920 = vst [vmem:[#allocation4 + $0x68] sm:$0xff] %v1911_v10 }
 0x39e   :  { %v1747_v30 = vpop.permute.xlu0 %1746  ;;  %v1896_v52 = vpop.permute.xlu1 %1895 }
 0x39f   :  { %v1756_v57 = vsel %vm1322_vm5, %v1747_v30, %v1749_v42  ;;  %v1910_v62 = vsel %vm1909_vm9, %v1894_v63, %v1896_v52 }
 0x3a0   :  { %1765 = vst [vmem:[#allocation4 + $0x30] sm:$0xff] %v1756_v57  ;;  %1919 = vst [vmem:[#allocation4 + $0x60] sm:$0xff] %v1910_v62 }
 0x3a2   :  { %v1751_v1 = vpop.permute.xlu0 %1750  ;;  %v1904_v13 = vpop.permute.xlu1 %1903 }
 0x3a3   :  { %v1757_v35 = vsel %vm1322_vm5, %v1751_v1, %v1753_v36  ;;  %v1912_v2 = vsel %vm1909_vm9, %v1902_v3, %v1904_v13 }
 0x3a4   :  { %1766 = vst [vmem:[#allocation4 + $0x38] sm:$0xff] %v1757_v35  ;;  %1921 = vst [vmem:[#allocation4 + $0x70] sm:$0xff] %v1912_v2 }
 0x3a6   :  { %v1906_v56 = vpop.permute.xlu0 %1905  ;;  %v1908_v37 = vpop.permute.xlu1 %1907 }
 0x3a7   :  { %v1913_v38 = vsel %vm1909_vm9, %v1906_v56, %v1908_v37 }
 0x3a8   :  { %1922 = vst [vmem:[#allocation4 + $0x78] sm:$0xff] %v1913_v38 }
 0x3a9   :  { %2371 = shalt.err (!%p2368_p4)
}
 0x3aa   :  { %s2372_s9 = scalar_lea.hbm %s3125_s5, 2048 }
 0x3ab   :  { %p2373_p5 = scmp.ne.s32.totalorder %s3125_s5, %s2372_s9  ;;  %p2376_p6 = scmp.lt.u32.totalorder %s2372_s9, %s3125_s5 }
 0x3ad   :  { %p2378_p7 = pnand %p2376_p6, %p2373_p5 }
 0x3af   :  { %2381 = shalt.err (!%p2378_p7)
}
 0x3b0   :  { %s2400_s13 = smov 128  }
 0x3b1   :  { %1934 = dma.vmem_to_hbm [thread:$0]  %s1929_s30, 2048, %s3125_s5, [#allocation5], %s2400_s13, %s2400_s13, %s2392_s8  }
 0x3b2   :  { %2382 = dma.done.wait [#allocation5], 2048  }
 0x3b3   :  { %2383 = vsyncadd [#allocation5], 4294965248 }
 0x3b4   :  { %1938 = vsyncpa [#allocation5], 1 }

</bundles_post_ra>
